<compile_context>
chip_gen: v7x
topology: tpu7x:2x2x1
jax: 0.10.0
libtpu: 0.0.40
codegen_flags: <defaults>
</compile_context>

<pallas_src>
import functools

import jax
import jax.numpy as jnp
from jax import lax
from jax.experimental import pallas as pl
from jax.experimental.pallas import tpu as pltpu


# ----------------------------------------------------------------------------
# Config (small instance consistent with PostNet.__init__ defaults)
# ----------------------------------------------------------------------------
CFG = dict(
    odim=16,       # mel channels (module: odim; first conv in, last conv out)
    n_chans=64,    # hidden conv channels (module default 512, small instance)
    n_layers=5,    # module default
    n_filts=5,     # kernel size, padding = (n_filts - 1) // 2
    bn_eps=1e-5,   # torch BatchNorm1d default eps
)


# ----------------------------------------------------------------------------
# Fused kernel: all PostNet layers, whole batch, one program (no grid)
# ----------------------------------------------------------------------------
def postnet_kernel(*refs, layer_dims, B, T, K, pad):
    """Fully fused PostNet forward.

    refs layout:
      refs[0]                    : x       (B, T, Cin0)          f32
      refs[1+3l], [2+3l], [3+3l] : w_l     (K*Cin_l, Cout_l)     bf16
                                   scale_l (1, Cout_l)           f32 (folded BN)
                                   shift_l (1, Cout_l)           f32 (folded BN)
      refs[1 + 3L]               : out     (B, T, Cout_last)     f32
      refs[2 + 3L]               : hp      (B, T + 2*pad, Cmax)  VMEM scratch
    """
    n_layers = len(layer_dims)
    x_ref = refs[0]
    o_ref = refs[1 + 3 * n_layers]
    hp = refs[2 + 3 * n_layers]

    # Zero the padded-activation scratch once: the `pad` halo rows at the top
    # and bottom of every batch element stay zero for every layer.
    hp[...] = jnp.zeros_like(hp)
    cin0 = layer_dims[0][0]
    hp[:, pad:pad + T, :cin0] = x_ref[...]

    y = None
    for l, (cin, cout) in enumerate(layer_dims):
        w = refs[1 + 3 * l][...]       # (K*cin, cout) bf16
        sc = refs[2 + 3 * l][...]      # (1, cout)     f32
        sh = refs[3 + 3 * l][...]      # (1, cout)     f32

        # im2col: K shifted (B*T, cin) slabs (batch folded into M) concatenated
        # on the lane axis -> ONE (B*T, K*cin) @ (K*cin, cout) MXU matmul.
        cols = [hp[:, k:k + T, :cin].reshape(B * T, cin).astype(jnp.bfloat16)
                for k in range(K)]
        patch = jnp.concatenate(cols, axis=-1)                 # (B*T, K*cin)
        y = jnp.dot(patch, w, preferred_element_type=jnp.float32)

        # Eval-mode BatchNorm folded to per-channel affine (f32), Tanh on all
        # but the last layer.  Dropout = identity in inference.
        y = y * sc + sh
        if l < n_layers - 1:
            y = jnp.tanh(y)
            hp[:, pad:pad + T, :cout] = y.reshape(B, T, cout)
        # TODO(synk): training-mode Dropout and batch-statistics BatchNorm are not implemented (eval path only).

    o_ref[...] = y.reshape(B, T, layer_dims[-1][1]).astype(o_ref.dtype)


# ----------------------------------------------------------------------------
# Wrapper
# ----------------------------------------------------------------------------
def postnet_forward(params, x):
    """PostNet.forward.  x: (B, T, odim) channel-last -> (B, T, odim)."""
    B, T, _ = x.shape
    K = params['n_filts']
    pad = (K - 1) // 2
    layer_dims = tuple((w.shape[0] // K, w.shape[1]) for w in params['w'])
    cmax = max(max(ci for ci, _ in layer_dims), max(co for _, co in layer_dims))

    flat = []
    for w, sc, sh in zip(params['w'], params['scale'], params['shift']):
        flat += [w, sc, sh]

    kern = functools.partial(postnet_kernel, layer_dims=layer_dims,
                             B=B, T=T, K=K, pad=pad)
    return pl.pallas_call(
        kern,
        out_shape=jax.ShapeDtypeStruct((B, T, layer_dims[-1][1]), jnp.float32),
        # No grid: single program, whole (tiny) arrays resident in VMEM.
        scratch_shapes=[pltpu.VMEM((B, T + 2 * pad, cmax), jnp.float32)],
    )(x, *flat)


# ----------------------------------------------------------------------------
# Deterministic parameter init (shapes from PostNet.__init__, BN folded)
# ----------------------------------------------------------------------------
def init_params(key, cfg):
    odim, n_chans = cfg['odim'], cfg['n_chans']
    L, K, eps = cfg['n_layers'], cfg['n_filts'], cfg['bn_eps']
    keys = jax.random.split(key, 8 * L)
    kit = iter(keys)

    def rnd(shape, scale=0.05):
        return jax.random.normal(next(kit), shape, jnp.float32) * scale

    w_f32, w_bf16, scales, shifts = [], [], [], []
    for l in range(L):
        cin = odim if l == 0 else n_chans
        cout = odim if l == L - 1 else n_chans
        # torch Conv1d weight (Cout, Cin, K), bias=False -> our layout
        # (K, Cin, Cout), flattened to (K*Cin, Cout) for the im2col matmul.
        w = rnd((K, cin, cout))
        # eval-mode BatchNorm1d folded: y = conv(x) * scale + shift
        gamma = 1.0 + rnd((cout,))
        beta = rnd((cout,))
        r_mean = rnd((cout,))
        r_var = 1.0 + jnp.abs(rnd((cout,)))
        scale = gamma * lax.rsqrt(r_var + eps)
        shift = beta - r_mean * scale
        w_f32.append(w)
        w_bf16.append(w.reshape(K * cin, cout).astype(jnp.bfloat16))
        scales.append(scale.reshape(1, cout))
        shifts.append(shift.reshape(1, cout))
    return dict(n_filts=K, w=w_bf16, w_f32=w_f32, scale=scales, shift=shifts)


# ----------------------------------------------------------------------------
# Pure-JAX reference (f32) for a correctness check
# ----------------------------------------------------------------------------
def postnet_reference(params, x):
    K = params['n_filts']
    pad = (K - 1) // 2
    L = len(params['w_f32'])
    h = x
    for l in range(L):
        w = params['w_f32'][l]                         # (K, Cin, Cout)
        T = h.shape[1]
        hp = jnp.pad(h, ((0, 0), (pad, pad), (0, 0)))
        y = sum(jnp.einsum('btc,co->bto', hp[:, k:k + T, :], w[k])
                for k in range(K))
        y = y * params['scale'][l] + params['shift'][l]
        if l < L - 1:
            y = jnp.tanh(y)
        h = y
    return y


# ----------------------------------------------------------------------------
if __name__ == "__main__":
    cfg = CFG
    key = jax.random.PRNGKey(0)
    kp, kx = jax.random.split(key)
    params = init_params(kp, cfg)

    B, T = 2, 16
    x = jax.random.normal(kx, (B, T, cfg['odim']), jnp.float32)

    out = postnet_forward(params, x)
    jax.block_until_ready(out)
    assert out.shape == (B, T, cfg['odim'])

    # bf16 MXU operands in the kernel vs f32 reference -> loose tolerance.
    ref = postnet_reference(params, x)
    max_err = float(jnp.max(jnp.abs(out - ref)))
    assert max_err < 1e-1, f"max abs err {max_err}"

    print("KERNEL_OK")
</pallas_src>

<mosaic_0001>
module attributes {stable_mosaic.version = 11 : i64} {
  func.func @postnet_kernel(%arg0: memref<2x16x16xf32, #tpu.memory_space<vmem>>, %arg1: memref<80x64xbf16, #tpu.memory_space<vmem>>, %arg2: memref<1x64xf32, #tpu.memory_space<vmem>>, %arg3: memref<1x64xf32, #tpu.memory_space<vmem>>, %arg4: memref<320x64xbf16, #tpu.memory_space<vmem>>, %arg5: memref<1x64xf32, #tpu.memory_space<vmem>>, %arg6: memref<1x64xf32, #tpu.memory_space<vmem>>, %arg7: memref<320x64xbf16, #tpu.memory_space<vmem>>, %arg8: memref<1x64xf32, #tpu.memory_space<vmem>>, %arg9: memref<1x64xf32, #tpu.memory_space<vmem>>, %arg10: memref<320x64xbf16, #tpu.memory_space<vmem>>, %arg11: memref<1x64xf32, #tpu.memory_space<vmem>>, %arg12: memref<1x64xf32, #tpu.memory_space<vmem>>, %arg13: memref<320x16xbf16, #tpu.memory_space<vmem>>, %arg14: memref<1x16xf32, #tpu.memory_space<vmem>>, %arg15: memref<1x16xf32, #tpu.memory_space<vmem>>, %arg16: memref<2x16x16xf32, #tpu.memory_space<vmem>>, %arg17: memref<2x20x64xf32, #tpu.memory_space<vmem>>) attributes {dimension_semantics = [], scalar_prefetch = 0 : i64, scratch_operands = 1 : i64, tpu.core_type = #tpu.core_type<tc>} {
    %cst = arith.constant 0.000000e+00 : f32
    %0 = vector.broadcast %cst : f32 to vector<2x20x64xf32>
    %c0 = arith.constant 0 : index
    %c0_0 = arith.constant 0 : index
    %c0_1 = arith.constant 0 : index
    %1 = vector.load %arg17[%c0, %c0_0, %c0_1] : memref<2x20x64xf32, #tpu.memory_space<vmem>>, vector<2x20x64xf32>
    tpu.vector_store %arg17[%c0, %c0_0, %c0_1], %0 {strides = array<i32>} : memref<2x20x64xf32, #tpu.memory_space<vmem>>, vector<2x20x64xf32>,
    %c0_2 = arith.constant 0 : index
    %c0_3 = arith.constant 0 : index
    %c0_4 = arith.constant 0 : index
    %2 = vector.load %arg0[%c0_2, %c0_3, %c0_4] : memref<2x16x16xf32, #tpu.memory_space<vmem>>, vector<2x16x16xf32>
    %c0_5 = arith.constant 0 : index
    %c2 = arith.constant 2 : index
    %c0_6 = arith.constant 0 : index
    %3 = vector.load %arg17[%c0_5, %c2, %c0_6] : memref<2x20x64xf32, #tpu.memory_space<vmem>>, vector<2x16x16xf32>
    tpu.vector_store %arg17[%c0_5, %c2, %c0_6], %2 {strides = array<i32>} : memref<2x20x64xf32, #tpu.memory_space<vmem>>, vector<2x16x16xf32>,
    %c0_7 = arith.constant 0 : index
    %c0_8 = arith.constant 0 : index
    %4 = vector.load %arg1[%c0_7, %c0_8] : memref<80x64xbf16, #tpu.memory_space<vmem>>, vector<80x64xbf16>
    %c0_9 = arith.constant 0 : index
    %c0_10 = arith.constant 0 : index
    %5 = vector.load %arg2[%c0_9, %c0_10] : memref<1x64xf32, #tpu.memory_space<vmem>>, vector<1x64xf32>
    %c0_11 = arith.constant 0 : index
    %c0_12 = arith.constant 0 : index
    %6 = vector.load %arg3[%c0_11, %c0_12] : memref<1x64xf32, #tpu.memory_space<vmem>>, vector<1x64xf32>
    %c0_13 = arith.constant 0 : index
    %c0_14 = arith.constant 0 : index
    %c0_15 = arith.constant 0 : index
    %7 = vector.load %arg17[%c0_13, %c0_14, %c0_15] : memref<2x20x64xf32, #tpu.memory_space<vmem>>, vector<2x16x16xf32>
    %8 = vector.shape_cast %7 : vector<2x16x16xf32> to vector<32x16xf32>
    %9 = arith.truncf %8 : vector<32x16xf32> to vector<32x16xbf16>
    %c0_16 = arith.constant 0 : index
    %c1 = arith.constant 1 : index
    %c0_17 = arith.constant 0 : index
    %10 = vector.load %arg17[%c0_16, %c1, %c0_17] : memref<2x20x64xf32, #tpu.memory_space<vmem>>, vector<2x16x16xf32>
    %11 = vector.shape_cast %10 : vector<2x16x16xf32> to vector<32x16xf32>
    %12 = arith.truncf %11 : vector<32x16xf32> to vector<32x16xbf16>
    %c0_18 = arith.constant 0 : index
    %c2_19 = arith.constant 2 : index
    %c0_20 = arith.constant 0 : index
    %13 = vector.load %arg17[%c0_18, %c2_19, %c0_20] : memref<2x20x64xf32, #tpu.memory_space<vmem>>, vector<2x16x16xf32>
    %14 = vector.shape_cast %13 : vector<2x16x16xf32> to vector<32x16xf32>
    %15 = arith.truncf %14 : vector<32x16xf32> to vector<32x16xbf16>
    %c0_21 = arith.constant 0 : index
    %c3 = arith.constant 3 : index
    %c0_22 = arith.constant 0 : index
    %16 = vector.load %arg17[%c0_21, %c3, %c0_22] : memref<2x20x64xf32, #tpu.memory_space<vmem>>, vector<2x16x16xf32>
    %17 = vector.shape_cast %16 : vector<2x16x16xf32> to vector<32x16xf32>
    %18 = arith.truncf %17 : vector<32x16xf32> to vector<32x16xbf16>
    %c0_23 = arith.constant 0 : index
    %c4 = arith.constant 4 : index
    %c0_24 = arith.constant 0 : index
    %19 = vector.load %arg17[%c0_23, %c4, %c0_24] : memref<2x20x64xf32, #tpu.memory_space<vmem>>, vector<2x16x16xf32>
    %20 = vector.shape_cast %19 : vector<2x16x16xf32> to vector<32x16xf32>
    %21 = arith.truncf %20 : vector<32x16xf32> to vector<32x16xbf16>
    %22 = tpu.concatenate %9, %12, %15, %18, %21 in 1 : vector<32x16xbf16>, vector<32x16xbf16>, vector<32x16xbf16>, vector<32x16xbf16>, vector<32x16xbf16> -> vector<32x80xbf16>
    %cst_25 = arith.constant dense<0.000000e+00> : vector<32x64xf32>
    %23 = tpu.matmul %22, %4, %cst_25 {dimension_numbers = #tpu.dot_dimension_numbers<[1], [0], [0], [1], [0, 0, 1, 1], [], []>} : vector<32x80xbf16>, vector<80x64xbf16>, vector<32x64xf32> -> vector<32x64xf32>
    %24 = vector.broadcast %5 : vector<1x64xf32> to vector<32x64xf32>
    %25 = arith.mulf %23, %24 : vector<32x64xf32>
    %26 = vector.broadcast %6 : vector<1x64xf32> to vector<32x64xf32>
    %27 = arith.addf %25, %26 : vector<32x64xf32>
    %28 = math.tanh %27 : vector<32x64xf32>
    %29 = vector.shape_cast %28 : vector<32x64xf32> to vector<2x16x64xf32>
    %c0_26 = arith.constant 0 : index
    %c2_27 = arith.constant 2 : index
    %c0_28 = arith.constant 0 : index
    %30 = vector.load %arg17[%c0_26, %c2_27, %c0_28] : memref<2x20x64xf32, #tpu.memory_space<vmem>>, vector<2x16x64xf32>
    tpu.vector_store %arg17[%c0_26, %c2_27, %c0_28], %29 {strides = array<i32>} : memref<2x20x64xf32, #tpu.memory_space<vmem>>, vector<2x16x64xf32>,
    %c0_29 = arith.constant 0 : index
    %c0_30 = arith.constant 0 : index
    %31 = vector.load %arg4[%c0_29, %c0_30] : memref<320x64xbf16, #tpu.memory_space<vmem>>, vector<320x64xbf16>
    %c0_31 = arith.constant 0 : index
    %c0_32 = arith.constant 0 : index
    %32 = vector.load %arg5[%c0_31, %c0_32] : memref<1x64xf32, #tpu.memory_space<vmem>>, vector<1x64xf32>
    %c0_33 = arith.constant 0 : index
    %c0_34 = arith.constant 0 : index
    %33 = vector.load %arg6[%c0_33, %c0_34] : memref<1x64xf32, #tpu.memory_space<vmem>>, vector<1x64xf32>
    %c0_35 = arith.constant 0 : index
    %c0_36 = arith.constant 0 : index
    %c0_37 = arith.constant 0 : index
    %34 = vector.load %arg17[%c0_35, %c0_36, %c0_37] : memref<2x20x64xf32, #tpu.memory_space<vmem>>, vector<2x16x64xf32>
    %35 = vector.shape_cast %34 : vector<2x16x64xf32> to vector<32x64xf32>
    %36 = arith.truncf %35 : vector<32x64xf32> to vector<32x64xbf16>
    %c0_38 = arith.constant 0 : index
    %c1_39 = arith.constant 1 : index
    %c0_40 = arith.constant 0 : index
    %37 = vector.load %arg17[%c0_38, %c1_39, %c0_40] : memref<2x20x64xf32, #tpu.memory_space<vmem>>, vector<2x16x64xf32>
    %38 = vector.shape_cast %37 : vector<2x16x64xf32> to vector<32x64xf32>
    %39 = arith.truncf %38 : vector<32x64xf32> to vector<32x64xbf16>
    %c0_41 = arith.constant 0 : index
    %c2_42 = arith.constant 2 : index
    %c0_43 = arith.constant 0 : index
    %40 = vector.load %arg17[%c0_41, %c2_42, %c0_43] : memref<2x20x64xf32, #tpu.memory_space<vmem>>, vector<2x16x64xf32>
    %41 = vector.shape_cast %40 : vector<2x16x64xf32> to vector<32x64xf32>
    %42 = arith.truncf %41 : vector<32x64xf32> to vector<32x64xbf16>
    %c0_44 = arith.constant 0 : index
    %c3_45 = arith.constant 3 : index
    %c0_46 = arith.constant 0 : index
    %43 = vector.load %arg17[%c0_44, %c3_45, %c0_46] : memref<2x20x64xf32, #tpu.memory_space<vmem>>, vector<2x16x64xf32>
    %44 = vector.shape_cast %43 : vector<2x16x64xf32> to vector<32x64xf32>
    %45 = arith.truncf %44 : vector<32x64xf32> to vector<32x64xbf16>
    %c0_47 = arith.constant 0 : index
    %c4_48 = arith.constant 4 : index
    %c0_49 = arith.constant 0 : index
    %46 = vector.load %arg17[%c0_47, %c4_48, %c0_49] : memref<2x20x64xf32, #tpu.memory_space<vmem>>, vector<2x16x64xf32>
    %47 = vector.shape_cast %46 : vector<2x16x64xf32> to vector<32x64xf32>
    %48 = arith.truncf %47 : vector<32x64xf32> to vector<32x64xbf16>
    %49 = tpu.concatenate %36, %39, %42, %45, %48 in 1 : vector<32x64xbf16>, vector<32x64xbf16>, vector<32x64xbf16>, vector<32x64xbf16>, vector<32x64xbf16> -> vector<32x320xbf16>
    %cst_50 = arith.constant dense<0.000000e+00> : vector<32x64xf32>
    %50 = tpu.matmul %49, %31, %cst_50 {dimension_numbers = #tpu.dot_dimension_numbers<[1], [0], [0], [1], [0, 0, 1, 1], [], []>} : vector<32x320xbf16>, vector<320x64xbf16>, vector<32x64xf32> -> vector<32x64xf32>
    %51 = vector.broadcast %32 : vector<1x64xf32> to vector<32x64xf32>
    %52 = arith.mulf %50, %51 : vector<32x64xf32>
    %53 = vector.broadcast %33 : vector<1x64xf32> to vector<32x64xf32>
    %54 = arith.addf %52, %53 : vector<32x64xf32>
    %55 = math.tanh %54 : vector<32x64xf32>
    %56 = vector.shape_cast %55 : vector<32x64xf32> to vector<2x16x64xf32>
    %c0_51 = arith.constant 0 : index
    %c2_52 = arith.constant 2 : index
    %c0_53 = arith.constant 0 : index
    %57 = vector.load %arg17[%c0_51, %c2_52, %c0_53] : memref<2x20x64xf32, #tpu.memory_space<vmem>>, vector<2x16x64xf32>
    tpu.vector_store %arg17[%c0_51, %c2_52, %c0_53], %56 {strides = array<i32>} : memref<2x20x64xf32, #tpu.memory_space<vmem>>, vector<2x16x64xf32>,
    %c0_54 = arith.constant 0 : index
    %c0_55 = arith.constant 0 : index
    %58 = vector.load %arg7[%c0_54, %c0_55] : memref<320x64xbf16, #tpu.memory_space<vmem>>, vector<320x64xbf16>
    %c0_56 = arith.constant 0 : index
    %c0_57 = arith.constant 0 : index
    %59 = vector.load %arg8[%c0_56, %c0_57] : memref<1x64xf32, #tpu.memory_space<vmem>>, vector<1x64xf32>
    %c0_58 = arith.constant 0 : index
    %c0_59 = arith.constant 0 : index
    %60 = vector.load %arg9[%c0_58, %c0_59] : memref<1x64xf32, #tpu.memory_space<vmem>>, vector<1x64xf32>
    %c0_60 = arith.constant 0 : index
    %c0_61 = arith.constant 0 : index
    %c0_62 = arith.constant 0 : index
    %61 = vector.load %arg17[%c0_60, %c0_61, %c0_62] : memref<2x20x64xf32, #tpu.memory_space<vmem>>, vector<2x16x64xf32>
    %62 = vector.shape_cast %61 : vector<2x16x64xf32> to vector<32x64xf32>
    %63 = arith.truncf %62 : vector<32x64xf32> to vector<32x64xbf16>
    %c0_63 = arith.constant 0 : index
    %c1_64 = arith.constant 1 : index
    %c0_65 = arith.constant 0 : index
    %64 = vector.load %arg17[%c0_63, %c1_64, %c0_65] : memref<2x20x64xf32, #tpu.memory_space<vmem>>, vector<2x16x64xf32>
    %65 = vector.shape_cast %64 : vector<2x16x64xf32> to vector<32x64xf32>
    %66 = arith.truncf %65 : vector<32x64xf32> to vector<32x64xbf16>
    %c0_66 = arith.constant 0 : index
    %c2_67 = arith.constant 2 : index
    %c0_68 = arith.constant 0 : index
    %67 = vector.load %arg17[%c0_66, %c2_67, %c0_68] : memref<2x20x64xf32, #tpu.memory_space<vmem>>, vector<2x16x64xf32>
    %68 = vector.shape_cast %67 : vector<2x16x64xf32> to vector<32x64xf32>
    %69 = arith.truncf %68 : vector<32x64xf32> to vector<32x64xbf16>
    %c0_69 = arith.constant 0 : index
    %c3_70 = arith.constant 3 : index
    %c0_71 = arith.constant 0 : index
    %70 = vector.load %arg17[%c0_69, %c3_70, %c0_71] : memref<2x20x64xf32, #tpu.memory_space<vmem>>, vector<2x16x64xf32>
    %71 = vector.shape_cast %70 : vector<2x16x64xf32> to vector<32x64xf32>
    %72 = arith.truncf %71 : vector<32x64xf32> to vector<32x64xbf16>
    %c0_72 = arith.constant 0 : index
    %c4_73 = arith.constant 4 : index
    %c0_74 = arith.constant 0 : index
    %73 = vector.load %arg17[%c0_72, %c4_73, %c0_74] : memref<2x20x64xf32, #tpu.memory_space<vmem>>, vector<2x16x64xf32>
    %74 = vector.shape_cast %73 : vector<2x16x64xf32> to vector<32x64xf32>
    %75 = arith.truncf %74 : vector<32x64xf32> to vector<32x64xbf16>
    %76 = tpu.concatenate %63, %66, %69, %72, %75 in 1 : vector<32x64xbf16>, vector<32x64xbf16>, vector<32x64xbf16>, vector<32x64xbf16>, vector<32x64xbf16> -> vector<32x320xbf16>
    %cst_75 = arith.constant dense<0.000000e+00> : vector<32x64xf32>
    %77 = tpu.matmul %76, %58, %cst_75 {dimension_numbers = #tpu.dot_dimension_numbers<[1], [0], [0], [1], [0, 0, 1, 1], [], []>} : vector<32x320xbf16>, vector<320x64xbf16>, vector<32x64xf32> -> vector<32x64xf32>
    %78 = vector.broadcast %59 : vector<1x64xf32> to vector<32x64xf32>
    %79 = arith.mulf %77, %78 : vector<32x64xf32>
    %80 = vector.broadcast %60 : vector<1x64xf32> to vector<32x64xf32>
    %81 = arith.addf %79, %80 : vector<32x64xf32>
    %82 = math.tanh %81 : vector<32x64xf32>
    %83 = vector.shape_cast %82 : vector<32x64xf32> to vector<2x16x64xf32>
    %c0_76 = arith.constant 0 : index
    %c2_77 = arith.constant 2 : index
    %c0_78 = arith.constant 0 : index
    %84 = vector.load %arg17[%c0_76, %c2_77, %c0_78] : memref<2x20x64xf32, #tpu.memory_space<vmem>>, vector<2x16x64xf32>
    tpu.vector_store %arg17[%c0_76, %c2_77, %c0_78], %83 {strides = array<i32>} : memref<2x20x64xf32, #tpu.memory_space<vmem>>, vector<2x16x64xf32>,
    %c0_79 = arith.constant 0 : index
    %c0_80 = arith.constant 0 : index
    %85 = vector.load %arg10[%c0_79, %c0_80] : memref<320x64xbf16, #tpu.memory_space<vmem>>, vector<320x64xbf16>
    %c0_81 = arith.constant 0 : index
    %c0_82 = arith.constant 0 : index
    %86 = vector.load %arg11[%c0_81, %c0_82] : memref<1x64xf32, #tpu.memory_space<vmem>>, vector<1x64xf32>
    %c0_83 = arith.constant 0 : index
    %c0_84 = arith.constant 0 : index
    %87 = vector.load %arg12[%c0_83, %c0_84] : memref<1x64xf32, #tpu.memory_space<vmem>>, vector<1x64xf32>
    %c0_85 = arith.constant 0 : index
    %c0_86 = arith.constant 0 : index
    %c0_87 = arith.constant 0 : index
    %88 = vector.load %arg17[%c0_85, %c0_86, %c0_87] : memref<2x20x64xf32, #tpu.memory_space<vmem>>, vector<2x16x64xf32>
    %89 = vector.shape_cast %88 : vector<2x16x64xf32> to vector<32x64xf32>
    %90 = arith.truncf %89 : vector<32x64xf32> to vector<32x64xbf16>
    %c0_88 = arith.constant 0 : index
    %c1_89 = arith.constant 1 : index
    %c0_90 = arith.constant 0 : index
    %91 = vector.load %arg17[%c0_88, %c1_89, %c0_90] : memref<2x20x64xf32, #tpu.memory_space<vmem>>, vector<2x16x64xf32>
    %92 = vector.shape_cast %91 : vector<2x16x64xf32> to vector<32x64xf32>
    %93 = arith.truncf %92 : vector<32x64xf32> to vector<32x64xbf16>
    %c0_91 = arith.constant 0 : index
    %c2_92 = arith.constant 2 : index
    %c0_93 = arith.constant 0 : index
    %94 = vector.load %arg17[%c0_91, %c2_92, %c0_93] : memref<2x20x64xf32, #tpu.memory_space<vmem>>, vector<2x16x64xf32>
    %95 = vector.shape_cast %94 : vector<2x16x64xf32> to vector<32x64xf32>
    %96 = arith.truncf %95 : vector<32x64xf32> to vector<32x64xbf16>
    %c0_94 = arith.constant 0 : index
    %c3_95 = arith.constant 3 : index
    %c0_96 = arith.constant 0 : index
    %97 = vector.load %arg17[%c0_94, %c3_95, %c0_96] : memref<2x20x64xf32, #tpu.memory_space<vmem>>, vector<2x16x64xf32>
    %98 = vector.shape_cast %97 : vector<2x16x64xf32> to vector<32x64xf32>
    %99 = arith.truncf %98 : vector<32x64xf32> to vector<32x64xbf16>
    %c0_97 = arith.constant 0 : index
    %c4_98 = arith.constant 4 : index
    %c0_99 = arith.constant 0 : index
    %100 = vector.load %arg17[%c0_97, %c4_98, %c0_99] : memref<2x20x64xf32, #tpu.memory_space<vmem>>, vector<2x16x64xf32>
    %101 = vector.shape_cast %100 : vector<2x16x64xf32> to vector<32x64xf32>
    %102 = arith.truncf %101 : vector<32x64xf32> to vector<32x64xbf16>
    %103 = tpu.concatenate %90, %93, %96, %99, %102 in 1 : vector<32x64xbf16>, vector<32x64xbf16>, vector<32x64xbf16>, vector<32x64xbf16>, vector<32x64xbf16> -> vector<32x320xbf16>
    %cst_100 = arith.constant dense<0.000000e+00> : vector<32x64xf32>
    %104 = tpu.matmul %103, %85, %cst_100 {dimension_numbers = #tpu.dot_dimension_numbers<[1], [0], [0], [1], [0, 0, 1, 1], [], []>} : vector<32x320xbf16>, vector<320x64xbf16>, vector<32x64xf32> -> vector<32x64xf32>
    %105 = vector.broadcast %86 : vector<1x64xf32> to vector<32x64xf32>
    %106 = arith.mulf %104, %105 : vector<32x64xf32>
    %107 = vector.broadcast %87 : vector<1x64xf32> to vector<32x64xf32>
    %108 = arith.addf %106, %107 : vector<32x64xf32>
    %109 = math.tanh %108 : vector<32x64xf32>
    %110 = vector.shape_cast %109 : vector<32x64xf32> to vector<2x16x64xf32>
    %c0_101 = arith.constant 0 : index
    %c2_102 = arith.constant 2 : index
    %c0_103 = arith.constant 0 : index
    %111 = vector.load %arg17[%c0_101, %c2_102, %c0_103] : memref<2x20x64xf32, #tpu.memory_space<vmem>>, vector<2x16x64xf32>
    tpu.vector_store %arg17[%c0_101, %c2_102, %c0_103], %110 {strides = array<i32>} : memref<2x20x64xf32, #tpu.memory_space<vmem>>, vector<2x16x64xf32>,
    %c0_104 = arith.constant 0 : index
    %c0_105 = arith.constant 0 : index
    %112 = vector.load %arg13[%c0_104, %c0_105] : memref<320x16xbf16, #tpu.memory_space<vmem>>, vector<320x16xbf16>
    %c0_106 = arith.constant 0 : index
    %c0_107 = arith.constant 0 : index
    %113 = vector.load %arg14[%c0_106, %c0_107] : memref<1x16xf32, #tpu.memory_space<vmem>>, vector<1x16xf32>
    %c0_108 = arith.constant 0 : index
    %c0_109 = arith.constant 0 : index
    %114 = vector.load %arg15[%c0_108, %c0_109] : memref<1x16xf32, #tpu.memory_space<vmem>>, vector<1x16xf32>
    %c0_110 = arith.constant 0 : index
    %c0_111 = arith.constant 0 : index
    %c0_112 = arith.constant 0 : index
    %115 = vector.load %arg17[%c0_110, %c0_111, %c0_112] : memref<2x20x64xf32, #tpu.memory_space<vmem>>, vector<2x16x64xf32>
    %116 = vector.shape_cast %115 : vector<2x16x64xf32> to vector<32x64xf32>
    %117 = arith.truncf %116 : vector<32x64xf32> to vector<32x64xbf16>
    %c0_113 = arith.constant 0 : index
    %c1_114 = arith.constant 1 : index
    %c0_115 = arith.constant 0 : index
    %118 = vector.load %arg17[%c0_113, %c1_114, %c0_115] : memref<2x20x64xf32, #tpu.memory_space<vmem>>, vector<2x16x64xf32>
    %119 = vector.shape_cast %118 : vector<2x16x64xf32> to vector<32x64xf32>
    %120 = arith.truncf %119 : vector<32x64xf32> to vector<32x64xbf16>
    %c0_116 = arith.constant 0 : index
    %c2_117 = arith.constant 2 : index
    %c0_118 = arith.constant 0 : index
    %121 = vector.load %arg17[%c0_116, %c2_117, %c0_118] : memref<2x20x64xf32, #tpu.memory_space<vmem>>, vector<2x16x64xf32>
    %122 = vector.shape_cast %121 : vector<2x16x64xf32> to vector<32x64xf32>
    %123 = arith.truncf %122 : vector<32x64xf32> to vector<32x64xbf16>
    %c0_119 = arith.constant 0 : index
    %c3_120 = arith.constant 3 : index
    %c0_121 = arith.constant 0 : index
    %124 = vector.load %arg17[%c0_119, %c3_120, %c0_121] : memref<2x20x64xf32, #tpu.memory_space<vmem>>, vector<2x16x64xf32>
    %125 = vector.shape_cast %124 : vector<2x16x64xf32> to vector<32x64xf32>
    %126 = arith.truncf %125 : vector<32x64xf32> to vector<32x64xbf16>
    %c0_122 = arith.constant 0 : index
    %c4_123 = arith.constant 4 : index
    %c0_124 = arith.constant 0 : index
    %127 = vector.load %arg17[%c0_122, %c4_123, %c0_124] : memref<2x20x64xf32, #tpu.memory_space<vmem>>, vector<2x16x64xf32>
    %128 = vector.shape_cast %127 : vector<2x16x64xf32> to vector<32x64xf32>
    %129 = arith.truncf %128 : vector<32x64xf32> to vector<32x64xbf16>
    %130 = tpu.concatenate %117, %120, %123, %126, %129 in 1 : vector<32x64xbf16>, vector<32x64xbf16>, vector<32x64xbf16>, vector<32x64xbf16>, vector<32x64xbf16> -> vector<32x320xbf16>
    %cst_125 = arith.constant dense<0.000000e+00> : vector<32x16xf32>
    %131 = tpu.matmul %130, %112, %cst_125 {dimension_numbers = #tpu.dot_dimension_numbers<[1], [0], [0], [1], [0, 0, 1, 1], [], []>} : vector<32x320xbf16>, vector<320x16xbf16>, vector<32x16xf32> -> vector<32x16xf32>
    %132 = vector.broadcast %113 : vector<1x16xf32> to vector<32x16xf32>
    %133 = arith.mulf %131, %132 : vector<32x16xf32>
    %134 = vector.broadcast %114 : vector<1x16xf32> to vector<32x16xf32>
    %135 = arith.addf %133, %134 : vector<32x16xf32>
    %136 = vector.shape_cast %135 : vector<32x16xf32> to vector<2x16x16xf32>
    %c0_126 = arith.constant 0 : index
    %c0_127 = arith.constant 0 : index
    %c0_128 = arith.constant 0 : index
    %137 = vector.load %arg16[%c0_126, %c0_127, %c0_128] : memref<2x16x16xf32, #tpu.memory_space<vmem>>, vector<2x16x16xf32>
    tpu.vector_store %arg16[%c0_126, %c0_127, %c0_128], %136 {strides = array<i32>} : memref<2x16x16xf32, #tpu.memory_space<vmem>>, vector<2x16x16xf32>,
    return
  }
}

</mosaic_0001>

<bundles_post_ra>
// kernel: tpu_custom_call.1
= control target key start
LH: loop header
LB: loop body
LE: loop exit
PB: predicated region body
PF: predicated region fallthrough
CT: control target
= control target key end

     0   :  { %s2631_s0 = inlined_call_operand.vmem [shape: f32[2,16,16], index: 0, kind: input, shape index: {}]   ;;  %s2632_s1 = inlined_call_operand.vmem [shape: bf16[80,64], index: 1, kind: input, shape index: {}]   ;;  %s2633_s2 = inlined_call_operand.vmem [shape: f32[1,64], index: 2, kind: input, shape index: {}]   ;;  %s2634_s3 = inlined_call_operand.vmem [shape: f32[1,64], index: 3, kind: input, shape index: {}]   ;;  %s2635_s4 = inlined_call_operand.vmem [shape: bf16[320,64], index: 4, kind: input, shape index: {}]   ;;  %s2636_s5 = inlined_call_operand.vmem [shape: f32[1,64], index: 5, kind: input, shape index: {}]   ;;  %s2637_s6 = inlined_call_operand.vmem [shape: f32[1,64], index: 6, kind: input, shape index: {}]   ;;  %s2638_s7 = inlined_call_operand.vmem [shape: bf16[320,64], index: 7, kind: input, shape index: {}]   ;;  %s2639_s8 = inlined_call_operand.vmem [shape: f32[1,64], index: 8, kind: input, shape index: {}]   ;;  %s2640_s9 = inlined_call_operand.vmem [shape: f32[1,64], index: 9, kind: input, shape index: {}]   ;;  %s2641_s10 = inlined_call_operand.vmem [shape: bf16[320,64], index: 10, kind: input, shape index: {}]   ;;  %s2642_s11 = inlined_call_operand.vmem [shape: f32[1,64], index: 11, kind: input, shape index: {}]   ;;  %s2643_s12 = inlined_call_operand.vmem [shape: f32[1,64], index: 12, kind: input, shape index: {}]   ;;  %s2644_s13 = inlined_call_operand.vmem [shape: bf16[320,16], index: 13, kind: input, shape index: {}]   ;;  %s2645_s14 = inlined_call_operand.vmem [shape: f32[1,16], index: 14, kind: input, shape index: {}]   ;;  %s2646_s15 = inlined_call_operand.vmem [shape: f32[1,16], index: 15, kind: input, shape index: {}]   ;;  %s2647_s16 = inlined_call_operand.hbm [shape: f32[2,16,16], index: 16, kind: output, shape index: {}]  }
   0x1   :  { %2649 = sst [smem:[#allocation6_spill]] %s2631_s0 }
   0x2   :  { %vm55_vm0 = vcmask 523264   ;;  %vm58_vm1 = vcmask 519168   ;;  %s2650_s23 = sld [smem:[#allocation6_spill]]  ;;  %vm67_vm2 = vcmask 130048   ;;  %v2149_v2 = vmov 0.0   ;;  %v2008_v5 = vld [vmem:[%s2632_s1] sm:$0xff]  }
   0x3   :  { %56 = vst.msk [vmem:[#allocation2] sm:$0xff] %vm55_vm0, %v2149_v2  ;;  %57 = vst.msk [vmem:[#allocation2 + $0x8] sm:$0xff] %vm55_vm0, %v2149_v2  ;;  %v2009_v6 = vld [vmem:[%s2632_s1 + $0x8] sm:$0xff]   ;;  %1938 = vmatprep.subr.bf16.mxu0 %v2008_v5  ;;  %v2010_v7 = vld [vmem:[%s2632_s1 + $0x10] sm:$0xff]   ;;  %s2151_s24 = smov 16   ;;  %s2152_s27 = smov 48  }
   0x4   :  { %59 = vst.msk [vmem:[#allocation2 + $0x10] sm:$0xf] %vm58_vm1, %v2149_v2  ;;  %62 = vst.msk [vmem:[#allocation2 + $0x28] sm:$0xf] %vm58_vm1, %v2149_v2  ;;  %1939 = vmatpush3.bf16.msra.mxu0 %v2008_v5  ;;  %v2011_v8 = vld [vmem:[%s2632_s1 + $0x18] sm:$0xff]   ;;  %v2012_v25 = vld [vmem:[%s2632_s1 + $0x20] sm:$0xff]  }
   0x5   :  { %60 = vst.msk [vmem:[#allocation2 + $0x18] sm:$0xff] %vm55_vm0, %v2149_v2  ;;  %61 = vst.msk [vmem:[#allocation2 + $0x20] sm:$0xff] %vm55_vm0, %v2149_v2  ;;  %1940 = vmatprep.subr.bf16.mxu0 %v2009_v6  ;;  %s2153_s28 = smov 64  }
   0x8   :  { %v63_v0 = vld [vmem:[%s2650_s23] sm:$0xff]  ;;  %v64_v1 = vld [vmem:[%s2650_s23 + $0x8] sm:$0xff]  ;;  %v65_v3 = vld [vmem:[%s2650_s23 + $0x10] sm:$0xff]  ;;  %1941 = vmatpush3.bf16.msra.mxu0 %v2009_v6 }
   0x9   :  { %v66_v4 = vld [vmem:[%s2650_s23 + $0x18] sm:$0xff]  ;;  %68 = vst.msk [vmem:[#allocation2 + $0x2] sm:$0xff] %vm67_vm2, %v63_v0  ;;  %69 = vst.msk [vmem:[#allocation2 + $0xa] sm:$0xff] %vm67_vm2, %v64_v1  ;;  %1942 = vmatprep.subr.bf16.mxu0 %v2010_v7  ;;  %s2150_s23 = smov 32  }
   0xa   :  { %70 = vst.msk [vmem:[#allocation2 + $0x1a] sm:$0xff] %vm67_vm2, %v65_v3  ;;  %71 = vst.msk [vmem:[#allocation2 + $0x22] sm:$0xff] %vm67_vm2, %v66_v4 }
   0xc   :  { %1943 = vmatpush3.bf16.msra.mxu0 %v2010_v7 }
   0xd   :  { %1944 = vmatprep.subr.bf16.mxu0 %v2011_v8 }
  0x10   :  { %v96_v9 = vld [vmem:[#allocation2 + $0x2] sm:$0xff]  ;;  %v97_v10 = vld [vmem:[#allocation2 + $0xa] sm:$0xff]  ;;  %1945 = vmatpush3.bf16.msra.mxu0 %v2011_v8 }
  0x11   :  { %v90_v11 = vld [vmem:[#allocation2 + $0x1] sm:$0xff]  ;;  %v100_v12 = vpack.c.bf16 %v97_v10, %v96_v9  ;;  %v91_v13 = vld [vmem:[#allocation2 + $0x9] sm:$0xff]  ;;  %v92_v17 = vld [vmem:[#allocation2 + $0x19] sm:$0xff]  ;;  %1946 = vmatprep.subr.bf16.mxu0 %v2012_v25 }
  0x12   :  { %v98_v14 = vld [vmem:[#allocation2 + $0x1a] sm:$0xff]  ;;  %v99_v15 = vld [vmem:[#allocation2 + $0x22] sm:$0xff]  ;;  %v94_v16 = vpack.c.bf16 %v91_v13, %v90_v11  ;;  %v103_v24 = vld [vmem:[#allocation2 + $0xb] sm:$0xff] }
  0x13   :  { %v93_v18 = vld [vmem:[#allocation2 + $0x21] sm:$0xff]  ;;  %122 = vrot.lane.b32.xlu1 %v100_v12, %s2150_s23  ;;  %v101_v19 = vpack.c.bf16 %v99_v15, %v98_v14  ;;  %v109_v30 = vld [vmem:[#allocation2 + $0xc] sm:$0xff] }
  0x14   :  { %116 = vrot.lane.b32.xlu0 %v94_v16, %s2151_s24  ;;  %v95_v20 = vpack.c.bf16 %v93_v18, %v92_v17  ;;  %v104_v21 = vld [vmem:[#allocation2 + $0x1b] sm:$0xff]  ;;  %v105_v22 = vld [vmem:[#allocation2 + $0x23] sm:$0xff]  ;;  %1947 = vmatpush3.bf16.msra.mxu0 %v2012_v25 }
  0x15   :  { %v102_v23 = vld [vmem:[#allocation2 + $0x3] sm:$0xff]  ;;  %v107_v28 = vpack.c.bf16 %v105_v22, %v104_v21 }
  0x16   :  { %v110_v26 = vld [vmem:[#allocation2 + $0x1c] sm:$0xff]  ;;  %v111_v27 = vld [vmem:[#allocation2 + $0x24] sm:$0xff]  ;;  %v106_v31 = vpack.c.bf16 %v103_v24, %v102_v23 }
  0x17   :  { %124 = vrot.lane.b32.xlu1 %v101_v19, %s2150_s23  ;;  %v108_v29 = vld [vmem:[#allocation2 + $0x4] sm:$0xff]  ;;  %v113_v32 = vpack.c.bf16 %v111_v27, %v110_v26 }
  0x18   :  { %118 = vrot.lane.b32.xlu0 %v95_v20, %s2151_s24  ;;  %v112_v33 = vpack.c.bf16 %v109_v30, %v108_v29 }
  0x1b   :  { %130 = vrot.lane.b32.xlu1 %v107_v28, %s2152_s27 }
  0x1c   :  { %128 = vrot.lane.b32.xlu0 %v106_v31, %s2152_s27 }
  0x1f   :  { %136 = vrot.lane.b32.xlu1 %v113_v32, %s2153_s28 }
  0x20   :  { %134 = vrot.lane.b32.xlu0 %v112_v33, %s2153_s28 }
  0x21   :  { %21 = vsyncpa [#allocation4], 0  ;;  %v86_v36 = vld [vmem:[#allocation2 + $0x18] sm:$0xff]  ;;  %v87_v37 = vld [vmem:[#allocation2 + $0x20] sm:$0xff]  ;;  %vm144_vm3 = vcmask 261120   ;;  %vm149_vm4 = vcmask 392192  }
  0x22   :  { %v84_v38 = vld [vmem:[#allocation2] sm:$0xff]  ;;  %v85_v39 = vld [vmem:[#allocation2 + $0x8] sm:$0xff]  ;;  %v89_v41 = vpack.c.bf16 %v87_v37, %v86_v36  ;;  %vm188_vm5 = vcmask 654336   ;;  %v2015_v58 = vld [vmem:[%s2635_s4 + $0x90] sm:$0xff]   ;;  %s2154_s1 = smov [#allocation3]  }
  0x23   :  { %v88_v42 = vpack.c.bf16 %v85_v39, %v84_v38  ;;  %v2013_v56 = vld [vmem:[%s2635_s4 + $0x80] sm:$0xff]   ;;  %v2014_v57 = vld [vmem:[%s2635_s4 + $0x88] sm:$0xff]   ;;  %v2016_v59 = vld [vmem:[%s2635_s4 + $0x98] sm:$0xff]   ;;  %s1679_s29 = sshll.u32 %s2154_s1, 4  ;;  %s1680_s29 = int_to_ptr.vmem [resolvable:$true] %s1679_s29 }
  0x24   :  { %1952 = vmatprep.subr.bf16.mxu0 %v2013_v56  ;;  %v2017_v60 = vld [vmem:[%s2635_s4 + $0x40] sm:$0xff]   ;;  %v2019_v62 = vld [vmem:[%s2635_s4 + $0x48] sm:$0xff]   ;;  %v2021_v0 = vld [vmem:[%s2635_s4 + $0x50] sm:$0xff]   ;;  %p2130_p1 = scmp.lt.s32.totalorder %s1680_s29, %s1680_s29 }
  0x25   :  { %v2018_v61 = vld [vmem:[%s2635_s4] sm:$0xff]   ;;  %1802 = vmatprep.subr.bf16.mxu1 %v2017_v60  ;;  %v2020_v63 = vld [vmem:[%s2635_s4 + $0x8] sm:$0xff]   ;;  %v2022_v1 = vld [vmem:[%s2635_s4 + $0x10] sm:$0xff]  }
  0x26   :  { %1803 = vmatpush3.bf16.msra.mxu1 %v2018_v61  ;;  %v2023_v2 = vld [vmem:[%s2635_s4 + $0x58] sm:$0xff]   ;;  %v2025_v4 = vld [vmem:[%s2635_s4 + $0x60] sm:$0xff]   ;;  %v2027_v6 = vld [vmem:[%s2635_s4 + $0x68] sm:$0xff]  }
  0x27   :  { %1804 = vmatprep.subr.bf16.mxu1 %v2019_v62  ;;  %v2024_v3 = vld [vmem:[%s2635_s4 + $0x18] sm:$0xff]   ;;  %v2026_v5 = vld [vmem:[%s2635_s4 + $0x20] sm:$0xff]   ;;  %v2028_v7 = vld [vmem:[%s2635_s4 + $0x28] sm:$0xff]  }
  0x28   :  { %v2029_v8 = vld [vmem:[%s2635_s4 + $0x70] sm:$0xff]   ;;  %v2031_v10 = vld [vmem:[%s2635_s4 + $0x78] sm:$0xff]   ;;  %v1697_v12 = vld [vmem:[%s2633_s2] ss:$0 sm:$0xff] }
  0x29   :  { %v2030_v9 = vld [vmem:[%s2635_s4 + $0x30] sm:$0xff]   ;;  %v2032_v11 = vld [vmem:[%s2635_s4 + $0x38] sm:$0xff]   ;;  %v1698_v13 = vld [vmem:[%s2634_s3] ss:$0 sm:$0xff] }
  0x2a   :  { %1805 = vmatpush3.bf16.msra.mxu1 %v2020_v63 }
  0x2b   :  { %1806 = vmatprep.subr.bf16.mxu1 %v2021_v0 }
  0x2e   :  { %1807 = vmatpush3.bf16.msra.mxu1 %v2022_v1 }
  0x2f   :  { %1808 = vmatprep.subr.bf16.mxu1 %v2023_v2 }
  0x32   :  { %1809 = vmatpush3.bf16.msra.mxu1 %v2024_v3 }
  0x33   :  { %1810 = vmatprep.subr.bf16.mxu1 %v2025_v4 }
  0x36   :  { %1811 = vmatpush3.bf16.msra.mxu1 %v2026_v5 }
  0x37   :  { %1812 = vmatprep.subr.bf16.mxu1 %v2027_v6 }
  0x3a   :  { %1813 = vmatpush3.bf16.msra.mxu1 %v2028_v7 }
  0x3b   :  { %1814 = vmatprep.subr.bf16.mxu1 %v2029_v8  ;;  %v2033_v8 = vld [vmem:[%s2638_s7 + $0x80] sm:$0xff]  }
  0x3e   :  { %1815 = vmatpush3.bf16.msra.mxu1 %v2030_v9  ;;  %v2034_v9 = vld [vmem:[%s2638_s7 + $0x88] sm:$0xff]  }
  0x3f   :  { %1816 = vmatprep.subr.bf16.mxu1 %v2031_v10  ;;  %v2035_v10 = vld [vmem:[%s2638_s7 + $0x90] sm:$0xff]  }
  0x42   :  { %1817 = vmatpush3.bf16.msra.mxu1 %v2032_v11  ;;  %v2036_v11 = vld [vmem:[%s2638_s7 + $0x98] sm:$0xff]  }
  0x85   :  { %v123_v34 = vpop.permute.xlu1 %122 }
  0x86   :  { %v117_v35 = vpop.permute.xlu0 %116 }
  0x87   :  { %v140_v46 = vsel %vm67_vm2, %v88_v42, %v117_v35 }
  0x88   :  { %v146_v50 = vsel %vm144_vm3, %v140_v46, %v123_v34 }
  0x89   :  { %v125_v40 = vpop.permute.xlu1 %124 }
  0x8a   :  { %v119_v43 = vpop.permute.xlu0 %118 }
  0x8b   :  { %v143_v44 = vsel %vm67_vm2, %v89_v41, %v119_v43 }
  0x8c   :  { %v148_v48 = vsel %vm144_vm3, %v143_v44, %v125_v40 }
  0x8d   :  { %v131_v45 = vpop.permute.xlu1 %130 }
  0x8e   :  { %v129_v47 = vpop.permute.xlu0 %128  ;;  %v153_v49 = vsel %vm149_vm4, %v148_v48, %v131_v45 }
  0x8f   :  { %v151_v52 = vsel %vm149_vm4, %v146_v50, %v129_v47 }
  0x91   :  { %v137_v51 = vpop.permute.xlu1 %136 }
  0x92   :  { %v157_v53 = vsel %vm55_vm0, %v153_v49, %v137_v51  ;;  %v135_v54 = vpop.permute.xlu0 %134 }
  0x93   :  { %v155_v55 = vsel %vm55_vm0, %v151_v52, %v135_v54 }
  0x94   :  { %1948 = vmatprep.mubr.msk.bf16.mxu0 %vm188_vm5, %v155_v55 }
  0x95   :  { %1949 = vmatmul.mubr.msk.bf16.vlgmr.msra.gmra.mrb[0].mxu0 %vm188_vm5, %v157_v53 }
  0x96   :  { %1953 = vmatpush3.bf16.msra.mxu0 %v2013_v56 }
  0x97   :  { %1954 = vmatprep.subr.bf16.mxu0 %v2014_v57 }
  0x9a   :  { %1955 = vmatpush3.bf16.msra.mxu0 %v2014_v57 }
  0x9b   :  { %1956 = vmatprep.subr.bf16.mxu0 %v2015_v58 }
  0x9e   :  { %1957 = vmatpush3.bf16.msra.mxu0 %v2015_v58 }
  0x9f   :  { %1958 = vmatprep.subr.bf16.mxu0 %v2016_v59 }
  0xa2   :  { %1959 = vmatpush3.bf16.msra.mxu0 %v2016_v59 }
  0xa3   :  { %1964 = vmatprep.subr.bf16.mxu0 %v2033_v8 }
 0x168   :  { %v1950_v14 = vpop.f32.mrb[0].mxu0 }
 0x169   :  { %v250_v15 = vmul.f32 %v1950_v14, %v1697_v12  ;;  %v227_v16 = vpop.f32.mrb[1].mxu0  ;;  %v2039_v14 = vld [vmem:[%s2638_s7 + $0x48] sm:$0xff]  }
 0x16a   :  { %v248_v17 = vmul.f32 %v1697_v12, %v227_v16  ;;  %v1951_v18 = vpop.f32.mrb[2].mxu0  ;;  %v2041_v16 = vld [vmem:[%s2638_s7 + $0x50] sm:$0xff]  }
 0x16b   :  { %v260_v19 = vadd.f32 %v1698_v13, %v250_v15  ;;  %v251_v20 = vmul.f32 %v1951_v18, %v1697_v12  ;;  %v230_v21 = vpop.f32.mrb[3].mxu0  ;;  %v2040_v15 = vld [vmem:[%s2638_s7 + $0x8] sm:$0xff]   ;;  %v2043_v18 = vld [vmem:[%s2638_s7 + $0x58] sm:$0xff]  }
 0x16c   :  { %v258_v22 = vadd.f32 %v1698_v13, %v248_v17  ;;  %v249_v23 = vmul.f32 %v1697_v12, %v230_v21  ;;  %v2037_v12 = vld [vmem:[%s2638_s7 + $0x40] sm:$0xff]   ;;  %v2042_v17 = vld [vmem:[%s2638_s7 + $0x10] sm:$0xff]  }
 0x16d   :  { %2093 = vtanh.f32 %v260_v19  ;;  %v261_v24 = vadd.f32 %v1698_v13, %v251_v20  ;;  %1836 = vmatprep.subr.bf16.mxu1 %v2037_v12  ;;  %v2044_v19 = vld [vmem:[%s2638_s7 + $0x18] sm:$0xff]   ;;  %v2045_v20 = vld [vmem:[%s2638_s7 + $0x60] sm:$0xff]  }
 0x16e   :  { %2095 = vtanh.f32 %v258_v22  ;;  %v259_v25 = vadd.f32 %v1698_v13, %v249_v23  ;;  %v2038_v13 = vld [vmem:[%s2638_s7] sm:$0xff]   ;;  %v2047_v22 = vld [vmem:[%s2638_s7 + $0x68] sm:$0xff]  }
 0x16f   :  { %2097 = vtanh.f32 %v261_v24  ;;  %v2046_v21 = vld [vmem:[%s2638_s7 + $0x20] sm:$0xff]   ;;  %v2048_v23 = vld [vmem:[%s2638_s7 + $0x28] sm:$0xff]   ;;  %v2049_v24 = vld [vmem:[%s2638_s7 + $0x70] sm:$0xff]  }
 0x170   :  { %2099 = vtanh.f32 %v259_v25  ;;  %v2050_v25 = vld [vmem:[%s2638_s7 + $0x30] sm:$0xff]  }
 0x177   :  { %v2094_v26 = vpop.eup %2093 }
 0x178   :  { %v2096_v27 = vpop.eup %2095  ;;  %268 = vst.msk [vmem:[#allocation2 + $0x1a] sm:$0xff] %vm55_vm0, %v2094_v26  ;;  %v2051_v26 = vld [vmem:[%s2638_s7 + $0x78] sm:$0xff]  }
 0x179   :  { %v2098_v28 = vpop.eup %2097  ;;  %266 = vst.msk [vmem:[#allocation2 + $0x2] sm:$0xff] %vm55_vm0, %v2096_v27  ;;  %v2052_v27 = vld [vmem:[%s2638_s7 + $0x38] sm:$0xff]  }
 0x17a   :  { %v2100_v29 = vpop.eup %2099  ;;  %269 = vst.msk [vmem:[#allocation2 + $0x22] sm:$0xff] %vm55_vm0, %v2098_v28 }
 0x17b   :  { %267 = vst.msk [vmem:[#allocation2 + $0xa] sm:$0xff] %vm55_vm0, %v2100_v29 }
 0x17f   :  { %v320_v45 = vld [vmem:[#allocation2 + $0x19] sm:$0xff] }
 0x180   :  { %v318_v37 = vld [vmem:[#allocation2 + $0x1] sm:$0xff]  ;;  %v314_v1 = vld [vmem:[#allocation2 + $0x18] sm:$0xff] }
 0x181   :  { %v338_v30 = vld [vmem:[#allocation2 + $0x1c] sm:$0xff]  ;;  %v339_v31 = vld [vmem:[#allocation2 + $0x24] sm:$0xff] }
 0x182   :  { %v336_v32 = vld [vmem:[#allocation2 + $0x4] sm:$0xff]  ;;  %v337_v33 = vld [vmem:[#allocation2 + $0xc] sm:$0xff]  ;;  %v341_v41 = vpack.c.bf16 %v339_v31, %v338_v30  ;;  %v332_v42 = vld [vmem:[#allocation2 + $0x1b] sm:$0xff] }
 0x183   :  { %v330_v34 = vld [vmem:[#allocation2 + $0x3] sm:$0xff]  ;;  %v340_v35 = vpack.c.bf16 %v337_v33, %v336_v32  ;;  %v331_v36 = vld [vmem:[#allocation2 + $0xb] sm:$0xff]  ;;  %v326_v59 = vld [vmem:[#allocation2 + $0x1a] sm:$0xff] }
 0x184   :  { %v319_v38 = vld [vmem:[#allocation2 + $0x9] sm:$0xff]  ;;  %v334_v39 = vpack.c.bf16 %v331_v36, %v330_v34  ;;  %v321_v44 = vld [vmem:[#allocation2 + $0x21] sm:$0xff]  ;;  %v1721_v32 = vld [vmem:[%s2636_s5] ss:$0 sm:$0xff] }
 0x185   :  { %v322_v40 = vpack.c.bf16 %v319_v38, %v318_v37  ;;  %1960 = vmatprep.mubr.msk.bf16.mxu0 %vm55_vm0, %v340_v35  ;;  %v333_v43 = vld [vmem:[#allocation2 + $0x23] sm:$0xff]  ;;  %v323_v47 = vpack.c.bf16 %v321_v44, %v320_v45  ;;  %v1722_v36 = vld [vmem:[%s2637_s6] ss:$0 sm:$0xff] }
 0x186   :  { %350 = vrot.lane.b32.xlu0 %v334_v39, %s2153_s28  ;;  %1961 = vmatmul.mubr.msk.bf16.vlgmr.msra.gmra.mrb[4].mxu0 %vm55_vm0, %v341_v41  ;;  %v335_v46 = vpack.c.bf16 %v333_v43, %v332_v42  ;;  %v325_v48 = vld [vmem:[#allocation2 + $0xa] sm:$0xff]  ;;  %v324_v50 = vld [vmem:[#allocation2 + $0x2] sm:$0xff] }
 0x187   :  { %344 = vrot.lane.b32.xlu1 %v322_v40, %s2153_s28  ;;  %v313_v49 = vld [vmem:[#allocation2 + $0x8] sm:$0xff]  ;;  %v312_v51 = vld [vmem:[#allocation2] sm:$0xff]  ;;  %v328_v52 = vpack.c.bf16 %v325_v48, %v324_v50  ;;  %1965 = vmatpush3.bf16.msra.mxu0 %v2033_v8 }
 0x188   :  { %v316_v53 = vpack.c.bf16 %v313_v49, %v312_v51  ;;  %v327_v56 = vld [vmem:[#allocation2 + $0x22] sm:$0xff]  ;;  %1966 = vmatprep.subr.bf16.mxu0 %v2034_v9 }
 0x189   :  { %v329_v60 = vpack.c.bf16 %v327_v56, %v326_v59  ;;  %v315_v63 = vld [vmem:[#allocation2 + $0x20] sm:$0xff] }
 0x18a   :  { %352 = vrot.lane.b32.xlu0 %v335_v46, %s2153_s28  ;;  %v317_v2 = vpack.c.bf16 %v315_v63, %v314_v1 }
 0x18b   :  { %346 = vrot.lane.b32.xlu1 %v323_v47, %s2153_s28  ;;  %1967 = vmatpush3.bf16.msra.mxu0 %v2034_v9 }
 0x18c   :  { %1968 = vmatprep.subr.bf16.mxu0 %v2035_v10 }
 0x18f   :  { %1969 = vmatpush3.bf16.msra.mxu0 %v2035_v10 }
 0x190   :  { %1970 = vmatprep.subr.bf16.mxu0 %v2036_v11 }
 0x193   :  { %1971 = vmatpush3.bf16.msra.mxu0 %v2036_v11 }
 0x1f8   :  { %v351_v54 = vpop.permute.xlu0 %350 }
 0x1f9   :  { %v345_v55 = vpop.permute.xlu1 %344  ;;  %v364_v57 = vsel %vm55_vm0, %v328_v52, %v351_v54 }
 0x1fa   :  { %v356_v58 = vsel %vm55_vm0, %v316_v53, %v345_v55  ;;  %528 = vmatprep.mubr.bf16.mxu1 %v364_v57 }
 0x1fb   :  { %529 = vmatmul.mubr.bf16.vlgmr.msra.gmra.mrb[0].mxu1 %v356_v58 }
 0x1fc   :  { %v353_v61 = vpop.permute.xlu0 %352  ;;  %1837 = vmatpush3.bf16.msra.mxu1 %v2038_v13 }
 0x1fd   :  { %v368_v62 = vsel %vm55_vm0, %v329_v60, %v353_v61  ;;  %v347_v0 = vpop.permute.xlu1 %346  ;;  %1838 = vmatprep.subr.bf16.mxu1 %v2039_v14 }
 0x1fe   :  { %536 = vmatprep.mubr.bf16.mxu1 %v368_v62  ;;  %v360_v3 = vsel %vm55_vm0, %v317_v2, %v347_v0 }
 0x200   :  { %1839 = vmatpush3.bf16.msra.mxu1 %v2040_v15 }
 0x201   :  { %1840 = vmatprep.subr.bf16.mxu1 %v2041_v16 }
 0x203   :  { %537 = vmatmul.mubr.bf16.gmra.mrb[4].mxu1 %v360_v3 }
 0x204   :  { %1841 = vmatpush3.bf16.msra.mxu1 %v2042_v17 }
 0x205   :  { %1842 = vmatprep.subr.bf16.mxu1 %v2043_v18 }
 0x208   :  { %1843 = vmatpush3.bf16.msra.mxu1 %v2044_v19 }
 0x209   :  { %1844 = vmatprep.subr.bf16.mxu1 %v2045_v20 }
 0x20c   :  { %1845 = vmatpush3.bf16.msra.mxu1 %v2046_v21 }
 0x20d   :  { %1846 = vmatprep.subr.bf16.mxu1 %v2047_v22 }
 0x210   :  { %1847 = vmatpush3.bf16.msra.mxu1 %v2048_v23 }
 0x211   :  { %1848 = vmatprep.subr.bf16.mxu1 %v2049_v24 }
 0x214   :  { %1849 = vmatpush3.bf16.msra.mxu1 %v2050_v25 }
 0x215   :  { %1850 = vmatprep.subr.bf16.mxu1 %v2051_v26 }
 0x218   :  { %1851 = vmatpush3.bf16.msra.mxu1 %v2052_v27 }
 0x259   :  { %v2363_v4 = vpop.f32.mrb[4].mxu0 }
 0x25a   :  { %v579_v5 = vpop.f32.mrb[5].mxu0 }
 0x25b   :  { %v2365_v6 = vpop.f32.mrb[6].mxu0 }
 0x25c   :  { %v582_v7 = vpop.f32.mrb[7].mxu0 }
 0x2ce   :  { %v1818_v28 = vpop.f32.mrb[0].mxu1 }
 0x2cf   :  { %v1819_v29 = vpop.f32.mrb[1].mxu1 }
 0x2d0   :  { %v1820_v30 = vadd.f32 %v1819_v29, %v1818_v28  ;;  %v1821_v31 = vpop.f32.mrb[2].mxu1 }
 0x2d1   :  { %v1822_v33 = vpop.f32.mrb[3].mxu1 }
 0x2d2   :  { %v580_v34 = vadd.f32 %v1820_v30, %v579_v5  ;;  %v1823_v35 = vadd.f32 %v1822_v33, %v1821_v31 }
 0x2d4   :  { %v600_v37 = vmul.f32 %v1721_v32, %v580_v34  ;;  %v583_v38 = vadd.f32 %v1823_v35, %v582_v7 }
 0x2d6   :  { %v610_v39 = vadd.f32 %v1722_v36, %v600_v37  ;;  %v601_v40 = vmul.f32 %v1721_v32, %v583_v38  ;;  %v1824_v41 = vpop.f32.mrb[4].mxu1  ;;  %v2054_v37 = vld [vmem:[%s2641_s10] sm:$0xff]   ;;  %v2055_v38 = vld [vmem:[%s2641_s10 + $0x48] sm:$0xff]  }
 0x2d7   :  { %v1825_v42 = vpop.f32.mrb[5].mxu1 }
 0x2d8   :  { %2101 = vtanh.f32 %v610_v39  ;;  %v611_v43 = vadd.f32 %v1722_v36, %v601_v40  ;;  %v1826_v44 = vadd.f32 %v1825_v42, %v1824_v41  ;;  %v1827_v45 = vpop.f32.mrb[6].mxu1  ;;  %v2056_v39 = vld [vmem:[%s2641_s10 + $0x8] sm:$0xff]   ;;  %v2057_v40 = vld [vmem:[%s2641_s10 + $0x50] sm:$0xff]   ;;  %v2059_v42 = vld [vmem:[%s2641_s10 + $0x58] sm:$0xff]  }
 0x2d9   :  { %v1828_v46 = vpop.f32.mrb[7].mxu1  ;;  %v2058_v41 = vld [vmem:[%s2641_s10 + $0x10] sm:$0xff]  }
 0x2da   :  { %2103 = vtanh.f32 %v611_v43  ;;  %v588_v47 = vadd.f32 %v2363_v4, %v1826_v44  ;;  %v1829_v48 = vadd.f32 %v1828_v46, %v1827_v45  ;;  %v2060_v43 = vld [vmem:[%s2641_s10 + $0x18] sm:$0xff]   ;;  %v2061_v44 = vld [vmem:[%s2641_s10 + $0x60] sm:$0xff]   ;;  %v2063_v46 = vld [vmem:[%s2641_s10 + $0x68] sm:$0xff]  }
 0x2db   :  { %v2062_v45 = vld [vmem:[%s2641_s10 + $0x20] sm:$0xff]  }
 0x2dc   :  { %v602_v49 = vmul.f32 %v1721_v32, %v588_v47  ;;  %v591_v50 = vadd.f32 %v2365_v6, %v1829_v48  ;;  %v2064_v47 = vld [vmem:[%s2641_s10 + $0x28] sm:$0xff]   ;;  %v2065_v48 = vld [vmem:[%s2641_s10 + $0x70] sm:$0xff]  }
 0x2de   :  { %v612_v51 = vadd.f32 %v1722_v36, %v602_v49  ;;  %v603_v52 = vmul.f32 %v1721_v32, %v591_v50  ;;  %v2066_v49 = vld [vmem:[%s2641_s10 + $0x30] sm:$0xff]   ;;  %v2067_v50 = vld [vmem:[%s2641_s10 + $0x78] sm:$0xff]  }
 0x2e0   :  { %2105 = vtanh.f32 %v612_v51  ;;  %v613_v53 = vadd.f32 %v1722_v36, %v603_v52  ;;  %v2053_v36 = vld [vmem:[%s2641_s10 + $0x40] sm:$0xff]   ;;  %v2068_v51 = vld [vmem:[%s2641_s10 + $0x38] sm:$0xff]  }
 0x2e1   :  { %1870 = vmatprep.subr.bf16.mxu0 %v2053_v36 }
 0x2e2   :  { %v2102_v54 = vpop.eup %2101  ;;  %2107 = vtanh.f32 %v613_v53 }
 0x2e3   :  { %618 = vst.msk [vmem:[#allocation2 + $0x2] sm:$0xff] %vm55_vm0, %v2102_v54 }
 0x2e4   :  { %v2104_v55 = vpop.eup %2103 }
 0x2e5   :  { %619 = vst.msk [vmem:[#allocation2 + $0xa] sm:$0xff] %vm55_vm0, %v2104_v55 }
 0x2ea   :  { %v2106_v56 = vpop.eup %2105  ;;  %v670_v63 = vld [vmem:[#allocation2 + $0x1] sm:$0xff] }
 0x2eb   :  { %620 = vst.msk [vmem:[#allocation2 + $0x1a] sm:$0xff] %vm55_vm0, %v2106_v56  ;;  %v664_v14 = vld [vmem:[#allocation2] sm:$0xff] }
 0x2ec   :  { %v2108_v57 = vpop.eup %2107  ;;  %v688_v58 = vld [vmem:[#allocation2 + $0x4] sm:$0xff]  ;;  %v689_v59 = vld [vmem:[#allocation2 + $0xc] sm:$0xff]  ;;  %v1745_v56 = vld [vmem:[%s2639_s8] ss:$0 sm:$0xff] }
 0x2ed   :  { %v682_v60 = vld [vmem:[#allocation2 + $0x3] sm:$0xff]  ;;  %621 = vst.msk [vmem:[#allocation2 + $0x22] sm:$0xff] %vm55_vm0, %v2108_v57  ;;  %v692_v61 = vpack.c.bf16 %v689_v59, %v688_v58  ;;  %v683_v62 = vld [vmem:[#allocation2 + $0xb] sm:$0xff] }
 0x2ee   :  { %v671_v0 = vld [vmem:[#allocation2 + $0x9] sm:$0xff]  ;;  %v686_v1 = vpack.c.bf16 %v683_v62, %v682_v60  ;;  %v1746_v60 = vld [vmem:[%s2640_s9] ss:$0 sm:$0xff] }
 0x2ef   :  { %v674_v2 = vpack.c.bf16 %v671_v0, %v670_v63  ;;  %1972 = vmatprep.mubr.msk.bf16.mxu0 %vm55_vm0, %v692_v61  ;;  %v665_v12 = vld [vmem:[#allocation2 + $0x8] sm:$0xff] }
 0x2f0   :  { %702 = vrot.lane.b32.xlu0 %v686_v1, %s2153_s28  ;;  %v677_v13 = vld [vmem:[#allocation2 + $0xa] sm:$0xff]  ;;  %v676_v15 = vld [vmem:[#allocation2 + $0x2] sm:$0xff]  ;;  %v668_v16 = vpack.c.bf16 %v665_v12, %v664_v14 }
 0x2f1   :  { %696 = vrot.lane.b32.xlu1 %v674_v2, %s2153_s28  ;;  %v680_v17 = vpack.c.bf16 %v677_v13, %v676_v15  ;;  %v2069_v15 = vld [vmem:[%s2641_s10 + $0x80] sm:$0xff]  }
 0x2f2   :  { %v672_v8 = vld [vmem:[#allocation2 + $0x19] sm:$0xff] }
 0x2f3   :  { %v678_v24 = vld [vmem:[#allocation2 + $0x1a] sm:$0xff] }
 0x2f4   :  { %v690_v3 = vld [vmem:[#allocation2 + $0x1c] sm:$0xff]  ;;  %v691_v4 = vld [vmem:[#allocation2 + $0x24] sm:$0xff] }
 0x2f5   :  { %v684_v5 = vld [vmem:[#allocation2 + $0x1b] sm:$0xff]  ;;  %v693_v6 = vpack.c.bf16 %v691_v4, %v690_v3  ;;  %v685_v7 = vld [vmem:[#allocation2 + $0x23] sm:$0xff] }
 0x2f6   :  { %v673_v9 = vld [vmem:[#allocation2 + $0x21] sm:$0xff]  ;;  %v687_v10 = vpack.c.bf16 %v685_v7, %v684_v5  ;;  %v666_v25 = vld [vmem:[#allocation2 + $0x18] sm:$0xff] }
 0x2f7   :  { %v675_v11 = vpack.c.bf16 %v673_v9, %v672_v8  ;;  %1973 = vmatmul.mubr.msk.bf16.vlgmr.msra.gmra.mrb[8].mxu0 %vm55_vm0, %v693_v6  ;;  %v679_v22 = vld [vmem:[#allocation2 + $0x22] sm:$0xff] }
 0x2f8   :  { %704 = vrot.lane.b32.xlu0 %v687_v10, %s2153_s28  ;;  %v667_v23 = vld [vmem:[#allocation2 + $0x20] sm:$0xff]  ;;  %v681_v26 = vpack.c.bf16 %v679_v22, %v678_v24  ;;  %1871 = vmatpush3.bf16.msra.mxu0 %v2054_v37 }
 0x2f9   :  { %698 = vrot.lane.b32.xlu1 %v675_v11, %s2153_s28  ;;  %v669_v27 = vpack.c.bf16 %v667_v23, %v666_v25  ;;  %1872 = vmatprep.subr.bf16.mxu0 %v2055_v38 }
 0x2fc   :  { %1873 = vmatpush3.bf16.msra.mxu0 %v2056_v39 }
 0x2fd   :  { %1874 = vmatprep.subr.bf16.mxu0 %v2057_v40 }
 0x300   :  { %1875 = vmatpush3.bf16.msra.mxu0 %v2058_v41  ;;  %v2070_v41 = vld [vmem:[%s2641_s10 + $0x88] sm:$0xff]  }
 0x301   :  { %1876 = vmatprep.subr.bf16.mxu0 %v2059_v42 }
 0x304   :  { %1877 = vmatpush3.bf16.msra.mxu0 %v2060_v43 }
 0x305   :  { %1878 = vmatprep.subr.bf16.mxu0 %v2061_v44  ;;  %v2071_v44 = vld [vmem:[%s2641_s10 + $0x90] sm:$0xff]  }
 0x308   :  { %1879 = vmatpush3.bf16.msra.mxu0 %v2062_v45 }
 0x309   :  { %1880 = vmatprep.subr.bf16.mxu0 %v2063_v46 }
 0x30c   :  { %1881 = vmatpush3.bf16.msra.mxu0 %v2064_v47 }
 0x30d   :  { %1882 = vmatprep.subr.bf16.mxu0 %v2065_v48 }
 0x310   :  { %1883 = vmatpush3.bf16.msra.mxu0 %v2066_v49 }
 0x311   :  { %1884 = vmatprep.subr.bf16.mxu0 %v2067_v50 }
 0x314   :  { %1885 = vmatpush3.bf16.msra.mxu0 %v2068_v51 }
 0x315   :  { %1976 = vmatprep.subr.bf16.mxu0 %v2069_v15 }
 0x362   :  { %v703_v18 = vpop.permute.xlu0 %702 }
 0x363   :  { %v697_v19 = vpop.permute.xlu1 %696  ;;  %v716_v21 = vsel %vm55_vm0, %v680_v17, %v703_v18 }
 0x364   :  { %v708_v20 = vsel %vm55_vm0, %v668_v16, %v697_v19  ;;  %880 = vmatprep.mubr.bf16.mxu1 %v716_v21 }
 0x365   :  { %881 = vmatmul.mubr.bf16.vlgmr.msra.gmra.mrb[8].mxu1 %v708_v20 }
 0x36a   :  { %v705_v28 = vpop.permute.xlu0 %704 }
 0x36b   :  { %v699_v29 = vpop.permute.xlu1 %698  ;;  %v720_v30 = vsel %vm55_vm0, %v681_v26, %v705_v28 }
 0x36c   :  { %v712_v31 = vsel %vm55_vm0, %v669_v27, %v699_v29  ;;  %888 = vmatprep.mubr.bf16.mxu1 %v720_v30 }
 0x36d   :  { %889 = vmatmul.mubr.bf16.gmra.mrb[12].mxu1 %v712_v31 }
 0x3ca   :  { %v1974_v32 = vpop.f32.mrb[8].mxu0 }
 0x3cb   :  { %v931_v33 = vpop.f32.mrb[9].mxu0 }
 0x3cc   :  { %v1975_v34 = vpop.f32.mrb[10].mxu0 }
 0x3cd   :  { %v934_v35 = vpop.f32.mrb[11].mxu0 }
 0x438   :  { %v1852_v52 = vpop.f32.mrb[8].mxu1 }
 0x439   :  { %v1853_v53 = vpop.f32.mrb[9].mxu1 }
 0x43a   :  { %v1854_v54 = vadd.f32 %v1853_v53, %v1852_v52  ;;  %v1855_v55 = vpop.f32.mrb[10].mxu1 }
 0x43b   :  { %v1856_v57 = vpop.f32.mrb[11].mxu1 }
 0x43c   :  { %v932_v58 = vadd.f32 %v1854_v54, %v931_v33  ;;  %v1857_v59 = vadd.f32 %v1856_v57, %v1855_v55  ;;  %v2072_v55 = vld [vmem:[%s2641_s10 + $0x98] sm:$0xff]  }
 0x43e   :  { %v952_v61 = vmul.f32 %v1745_v56, %v932_v58  ;;  %v935_v62 = vadd.f32 %v1857_v59, %v934_v35 }
 0x440   :  { %v962_v63 = vadd.f32 %v1746_v60, %v952_v61  ;;  %v953_v0 = vmul.f32 %v1745_v56, %v935_v62  ;;  %v1858_v1 = vpop.f32.mrb[12].mxu1  ;;  %v2074_v61 = vld [vmem:[%s2644_s13] sm:$0xff]   ;;  %v2075_v62 = vld [vmem:[%s2644_s13 + $0x48] sm:$0xff]  }
 0x441   :  { %v1859_v2 = vpop.f32.mrb[13].mxu1 }
 0x442   :  { %2109 = vtanh.f32 %v962_v63  ;;  %v963_v3 = vadd.f32 %v1746_v60, %v953_v0  ;;  %v1860_v4 = vadd.f32 %v1859_v2, %v1858_v1  ;;  %v1861_v5 = vpop.f32.mrb[14].mxu1  ;;  %v2076_v63 = vld [vmem:[%s2644_s13 + $0x8] sm:$0xff]   ;;  %v2077_v0 = vld [vmem:[%s2644_s13 + $0x50] sm:$0xff]   ;;  %v2079_v2 = vld [vmem:[%s2644_s13 + $0x58] sm:$0xff]  }
 0x443   :  { %v1862_v6 = vpop.f32.mrb[15].mxu1  ;;  %v2078_v1 = vld [vmem:[%s2644_s13 + $0x10] sm:$0xff]  }
 0x444   :  { %2111 = vtanh.f32 %v963_v3  ;;  %v940_v7 = vadd.f32 %v1974_v32, %v1860_v4  ;;  %v1863_v8 = vadd.f32 %v1862_v6, %v1861_v5  ;;  %v2080_v3 = vld [vmem:[%s2644_s13 + $0x18] sm:$0xff]   ;;  %v2081_v4 = vld [vmem:[%s2644_s13 + $0x60] sm:$0xff]   ;;  %v2083_v6 = vld [vmem:[%s2644_s13 + $0x68] sm:$0xff]  }
 0x445   :  { %v2082_v5 = vld [vmem:[%s2644_s13 + $0x20] sm:$0xff]  }
 0x446   :  { %v954_v9 = vmul.f32 %v1745_v56, %v940_v7  ;;  %v943_v10 = vadd.f32 %v1975_v34, %v1863_v8  ;;  %v2084_v7 = vld [vmem:[%s2644_s13 + $0x28] sm:$0xff]   ;;  %v2085_v8 = vld [vmem:[%s2644_s13 + $0x70] sm:$0xff]  }
 0x448   :  { %v964_v11 = vadd.f32 %v1746_v60, %v954_v9  ;;  %v955_v12 = vmul.f32 %v1745_v56, %v943_v10  ;;  %v2086_v9 = vld [vmem:[%s2644_s13 + $0x30] sm:$0xff]   ;;  %v2087_v10 = vld [vmem:[%s2644_s13 + $0x78] sm:$0xff]  }
 0x44a   :  { %2113 = vtanh.f32 %v964_v11  ;;  %v965_v13 = vadd.f32 %v1746_v60, %v955_v12  ;;  %v2073_v60 = vld [vmem:[%s2644_s13 + $0x40] sm:$0xff]   ;;  %v2088_v11 = vld [vmem:[%s2644_s13 + $0x38] sm:$0xff]  }
 0x44b   :  { %1904 = vmatprep.subr.bf16.mxu1 %v2073_v60 }
 0x44c   :  { %v2110_v14 = vpop.eup %2109  ;;  %2115 = vtanh.f32 %v965_v13  ;;  %1905 = vmatpush3.bf16.msra.mxu1 %v2074_v61 }
 0x44d   :  { %970 = vst.msk [vmem:[#allocation2 + $0x2] sm:$0xff] %vm55_vm0, %v2110_v14  ;;  %1906 = vmatprep.subr.bf16.mxu1 %v2075_v62 }
 0x44e   :  { %v2112_v16 = vpop.eup %2111 }
 0x44f   :  { %971 = vst.msk [vmem:[#allocation2 + $0xa] sm:$0xff] %vm55_vm0, %v2112_v16 }
 0x450   :  { %1907 = vmatpush3.bf16.msra.mxu1 %v2076_v63 }
 0x451   :  { %1908 = vmatprep.subr.bf16.mxu1 %v2077_v0 }
 0x454   :  { %v2114_v17 = vpop.eup %2113  ;;  %v1022_v18 = vld [vmem:[#allocation2 + $0x1] sm:$0xff]  ;;  %1909 = vmatpush3.bf16.msra.mxu1 %v2078_v1 }
 0x455   :  { %972 = vst.msk [vmem:[#allocation2 + $0x1a] sm:$0xff] %vm55_vm0, %v2114_v17  ;;  %v1016_v33 = vld [vmem:[#allocation2] sm:$0xff]  ;;  %1910 = vmatprep.subr.bf16.mxu1 %v2079_v2 }
 0x456   :  { %v2116_v19 = vpop.eup %2115  ;;  %v1034_v20 = vld [vmem:[#allocation2 + $0x3] sm:$0xff]  ;;  %v1035_v21 = vld [vmem:[#allocation2 + $0xb] sm:$0xff] }
 0x457   :  { %v1023_v22 = vld [vmem:[#allocation2 + $0x9] sm:$0xff]  ;;  %973 = vst.msk [vmem:[#allocation2 + $0x22] sm:$0xff] %vm55_vm0, %v2116_v19  ;;  %v1038_v23 = vpack.c.bf16 %v1035_v21, %v1034_v20 }
 0x458   :  { %v1026_v24 = vpack.c.bf16 %v1023_v22, %v1022_v18  ;;  %v1017_v31 = vld [vmem:[#allocation2 + $0x8] sm:$0xff]  ;;  %1911 = vmatpush3.bf16.msra.mxu1 %v2080_v3 }
 0x459   :  { %1054 = vrot.lane.b32.xlu0 %v1038_v23, %s2153_s28  ;;  %v1029_v32 = vld [vmem:[#allocation2 + $0xa] sm:$0xff]  ;;  %v1028_v34 = vld [vmem:[#allocation2 + $0x2] sm:$0xff]  ;;  %v1020_v35 = vpack.c.bf16 %v1017_v31, %v1016_v33  ;;  %1912 = vmatprep.subr.bf16.mxu1 %v2081_v4 }
 0x45a   :  { %1048 = vrot.lane.b32.xlu1 %v1026_v24, %s2153_s28  ;;  %v1032_v36 = vpack.c.bf16 %v1029_v32, %v1028_v34  ;;  %v1040_v49 = vld [vmem:[#allocation2 + $0x4] sm:$0xff]  ;;  %v1041_v50 = vld [vmem:[#allocation2 + $0xc] sm:$0xff]  ;;  %v1769_v24 = vld [vmem:[%s2642_s11] ss:$0 sm:$0xff] }
 0x45b   :  { %v1044_v56 = vpack.c.bf16 %v1041_v50, %v1040_v49 }
 0x45c   :  { %v1024_v25 = vld [vmem:[#allocation2 + $0x19] sm:$0xff]  ;;  %1913 = vmatpush3.bf16.msra.mxu1 %v2082_v5 }
 0x45d   :  { %v1030_v45 = vld [vmem:[#allocation2 + $0x1a] sm:$0xff]  ;;  %1914 = vmatprep.subr.bf16.mxu1 %v2083_v6  ;;  %v2090_v6 = vld [vmem:[%s2644_s13 + $0x88] sm:$0xff]  }
 0x45e   :  { %v1036_v26 = vld [vmem:[#allocation2 + $0x1b] sm:$0xff]  ;;  %v1037_v27 = vld [vmem:[#allocation2 + $0x23] sm:$0xff] }
 0x45f   :  { %v1025_v28 = vld [vmem:[#allocation2 + $0x21] sm:$0xff]  ;;  %v1039_v29 = vpack.c.bf16 %v1037_v27, %v1036_v26  ;;  %v1018_v46 = vld [vmem:[#allocation2 + $0x18] sm:$0xff] }
 0x460   :  { %v1027_v30 = vpack.c.bf16 %v1025_v28, %v1024_v25  ;;  %v1031_v42 = vld [vmem:[#allocation2 + $0x22] sm:$0xff]  ;;  %1915 = vmatpush3.bf16.msra.mxu1 %v2084_v7  ;;  %v1770_v28 = vld [vmem:[%s2643_s12] ss:$0 sm:$0xff] }
 0x461   :  { %1056 = vrot.lane.b32.xlu0 %v1039_v29, %s2153_s28  ;;  %v1019_v43 = vld [vmem:[#allocation2 + $0x20] sm:$0xff]  ;;  %v1033_v47 = vpack.c.bf16 %v1031_v42, %v1030_v45  ;;  %1916 = vmatprep.subr.bf16.mxu1 %v2085_v8 }
 0x462   :  { %1050 = vrot.lane.b32.xlu1 %v1027_v30, %s2153_s28  ;;  %v1021_v48 = vpack.c.bf16 %v1019_v43, %v1018_v46  ;;  %v1042_v57 = vld [vmem:[#allocation2 + $0x1c] sm:$0xff]  ;;  %v1043_v58 = vld [vmem:[#allocation2 + $0x24] sm:$0xff] }
 0x463   :  { %v1045_v59 = vpack.c.bf16 %v1043_v58, %v1042_v57  ;;  %v2089_v45 = vld [vmem:[%s2644_s13 + $0x80] sm:$0xff]  }
 0x464   :  { %1917 = vmatpush3.bf16.msra.mxu1 %v2086_v9 }
 0x465   :  { %1918 = vmatprep.subr.bf16.mxu1 %v2087_v10 }
 0x468   :  { %1919 = vmatpush3.bf16.msra.mxu1 %v2088_v11  ;;  %v2091_v11 = vld [vmem:[%s2644_s13 + $0x90] sm:$0xff]  }
 0x469   :  { %1988 = vmatprep.subr.bf16.mxu1 %v2089_v45 }
 0x4cb   :  { %v1055_v37 = vpop.permute.xlu0 %1054 }
 0x4cc   :  { %v1049_v38 = vpop.permute.xlu1 %1048  ;;  %v1068_v40 = vsel %vm55_vm0, %v1032_v36, %v1055_v37 }
 0x4cd   :  { %v1060_v39 = vsel %vm55_vm0, %v1020_v35, %v1049_v38  ;;  %1232 = vmatprep.mubr.bf16.mxu0 %v1068_v40 }
 0x4ce   :  { %1233 = vmatmul.mubr.bf16.vlgmr.msra.gmra.mrb[12].mxu0 %v1060_v39 }
 0x4cf   :  { %1977 = vmatpush3.bf16.msra.mxu0 %v2069_v15 }
 0x4d0   :  { %1978 = vmatprep.subr.bf16.mxu0 %v2070_v41 }
 0x4d3   :  { %1979 = vmatpush3.bf16.msra.mxu0 %v2070_v41  ;;  %v1057_v51 = vpop.permute.xlu0 %1056 }
 0x4d4   :  { %v1051_v52 = vpop.permute.xlu1 %1050  ;;  %v1072_v53 = vsel %vm55_vm0, %v1033_v47, %v1057_v51  ;;  %1980 = vmatprep.subr.bf16.mxu0 %v2071_v44 }
 0x4d5   :  { %v1064_v54 = vsel %vm55_vm0, %v1021_v48, %v1051_v52  ;;  %1240 = vmatprep.mubr.bf16.mxu0 %v1072_v53 }
 0x4d6   :  { %1241 = vmatmul.mubr.bf16.gmra.mrb[16].mxu0 %v1064_v54 }
 0x4d7   :  { %1981 = vmatpush3.bf16.msra.mxu0 %v2071_v44  ;;  %1984 = vmatprep.mubr.msk.bf16.mxu0 %vm55_vm0, %v1044_v56 }
 0x4d8   :  { %1982 = vmatprep.subr.bf16.mxu0 %v2072_v55 }
 0x4db   :  { %1983 = vmatpush3.bf16.msra.mxu0 %v2072_v55 }
 0x4de   :  { %1985 = vmatmul.mubr.msk.bf16.vlgmr.msra.gmra.mrb[20].mxu0 %vm55_vm0, %v1045_v59 }
 0x5a1   :  { %v1886_v12 = vpop.f32.mrb[12].mxu0 }
 0x5a2   :  { %v1887_v13 = vpop.f32.mrb[13].mxu0 }
 0x5a3   :  { %v1888_v14 = vadd.f32 %v1887_v13, %v1886_v12  ;;  %v1889_v15 = vpop.f32.mrb[14].mxu0 }
 0x5a4   :  { %v1890_v16 = vpop.f32.mrb[15].mxu0 }
 0x5a5   :  { %v1891_v17 = vadd.f32 %v1890_v16, %v1889_v15 }
 0x5a9   :  { %v1892_v18 = vpop.f32.mrb[16].mxu0 }
 0x5aa   :  { %v1893_v19 = vpop.f32.mrb[17].mxu0 }
 0x5ab   :  { %v1894_v20 = vadd.f32 %v1893_v19, %v1892_v18  ;;  %v1895_v21 = vpop.f32.mrb[18].mxu0  ;;  %v2092_v18 = vld [vmem:[%s2644_s13 + $0x98] sm:$0xff]  }
 0x5ac   :  { %v1896_v22 = vpop.f32.mrb[19].mxu0 }
 0x5ad   :  { %v1897_v23 = vadd.f32 %v1896_v22, %v1895_v21 }
 0x5b1   :  { %v1986_v25 = vpop.f32.mrb[20].mxu0 }
 0x5b2   :  { %v1292_v26 = vadd.f32 %v1986_v25, %v1894_v20  ;;  %v1283_v27 = vpop.f32.mrb[21].mxu0 }
 0x5b3   :  { %v1284_v29 = vadd.f32 %v1888_v14, %v1283_v27  ;;  %v1987_v30 = vpop.f32.mrb[22].mxu0 }
 0x5b4   :  { %v1306_v31 = vmul.f32 %v1769_v24, %v1292_v26  ;;  %v1295_v32 = vadd.f32 %v1987_v30, %v1897_v23  ;;  %v1286_v33 = vpop.f32.mrb[23].mxu0 }
 0x5b5   :  { %v1304_v34 = vmul.f32 %v1769_v24, %v1284_v29  ;;  %v1287_v35 = vadd.f32 %v1891_v17, %v1286_v33 }
 0x5b6   :  { %v1316_v36 = vadd.f32 %v1770_v28, %v1306_v31  ;;  %v1307_v37 = vmul.f32 %v1769_v24, %v1295_v32 }
 0x5b7   :  { %v1314_v38 = vadd.f32 %v1770_v28, %v1304_v34  ;;  %v1305_v39 = vmul.f32 %v1769_v24, %v1287_v35 }
 0x5b8   :  { %2117 = vtanh.f32 %v1316_v36  ;;  %v1317_v40 = vadd.f32 %v1770_v28, %v1307_v37  ;;  %v1793_v36 = vld [vmem:[%s2645_s14] ss:$0 sm:$0xff]  ;;  %s2125_s14 = scalar_lea.vmem %s1680_s29, 512 }
 0x5b9   :  { %2119 = vtanh.f32 %v1314_v38  ;;  %v1315_v41 = vadd.f32 %v1770_v28, %v1305_v39  ;;  %p2126_p0 = scmp.ne.s32.totalorder %s1680_s29, %s2125_s14  ;;  %p2131_p2 = scmp.lt.s32.totalorder %s2125_s14, %s2125_s14 }
 0x5ba   :  { %2121 = vtanh.f32 %v1317_v40  ;;  %v1794_v40 = vld [vmem:[%s2646_s15] ss:$0 sm:$0xff] }
 0x5bb   :  { %2123 = vtanh.f32 %v1315_v41  ;;  %p2132_p3 = por %p2131_p2, %p2130_p1 }
 0x5bd   :  { %p2133_p4 = pnand %p2132_p3, %p2126_p0 }
 0x5c2   :  { %v2118_v42 = vpop.eup %2117 }
 0x5c3   :  { %v2120_v43 = vpop.eup %2119  ;;  %1324 = vst.msk [vmem:[#allocation2 + $0x1a] sm:$0xff] %vm55_vm0, %v2118_v42 }
 0x5c4   :  { %v2122_v44 = vpop.eup %2121  ;;  %1322 = vst.msk [vmem:[#allocation2 + $0x2] sm:$0xff] %vm55_vm0, %v2120_v43 }
 0x5c5   :  { %v2124_v46 = vpop.eup %2123  ;;  %1325 = vst.msk [vmem:[#allocation2 + $0x22] sm:$0xff] %vm55_vm0, %v2122_v44 }
 0x5c6   :  { %1323 = vst.msk [vmem:[#allocation2 + $0xa] sm:$0xff] %vm55_vm0, %v2124_v46 }
 0x5ca   :  { %v1376_v56 = vld [vmem:[#allocation2 + $0x19] sm:$0xff] }
 0x5cb   :  { %v1374_v47 = vld [vmem:[#allocation2 + $0x1] sm:$0xff]  ;;  %v1370_v14 = vld [vmem:[#allocation2 + $0x18] sm:$0xff] }
 0x5cc   :  { %v1388_v53 = vld [vmem:[#allocation2 + $0x1b] sm:$0xff]  ;;  %v1389_v54 = vld [vmem:[#allocation2 + $0x23] sm:$0xff] }
 0x5cd   :  { %v1386_v48 = vld [vmem:[#allocation2 + $0x3] sm:$0xff]  ;;  %v1387_v49 = vld [vmem:[#allocation2 + $0xb] sm:$0xff]  ;;  %v1391_v57 = vpack.c.bf16 %v1389_v54, %v1388_v53  ;;  %v1382_v7 = vld [vmem:[#allocation2 + $0x1a] sm:$0xff] }
 0x5ce   :  { %v1375_v50 = vld [vmem:[#allocation2 + $0x9] sm:$0xff]  ;;  %v1390_v51 = vpack.c.bf16 %v1387_v49, %v1386_v48  ;;  %v1377_v55 = vld [vmem:[#allocation2 + $0x21] sm:$0xff] }
 0x5cf   :  { %v1378_v52 = vpack.c.bf16 %v1375_v50, %v1374_v47  ;;  %v1379_v58 = vpack.c.bf16 %v1377_v55, %v1376_v56  ;;  %v1369_v59 = vld [vmem:[#allocation2 + $0x8] sm:$0xff]  ;;  %v1368_v61 = vld [vmem:[#allocation2] sm:$0xff] }
 0x5d0   :  { %1406 = vrot.lane.b32.xlu0 %v1390_v51, %s2153_s28  ;;  %v1381_v60 = vld [vmem:[#allocation2 + $0xa] sm:$0xff]  ;;  %v1380_v62 = vld [vmem:[#allocation2 + $0x2] sm:$0xff]  ;;  %v1372_v63 = vpack.c.bf16 %v1369_v59, %v1368_v61 }
 0x5d1   :  { %1400 = vrot.lane.b32.xlu1 %v1378_v52, %s2153_s28  ;;  %v1384_v0 = vpack.c.bf16 %v1381_v60, %v1380_v62  ;;  %v1383_v3 = vld [vmem:[#allocation2 + $0x22] sm:$0xff]  ;;  %v1393_v16 = vld [vmem:[#allocation2 + $0xc] sm:$0xff] }
 0x5d2   :  { %v1385_v8 = vpack.c.bf16 %v1383_v3, %v1382_v7  ;;  %v1371_v12 = vld [vmem:[#allocation2 + $0x20] sm:$0xff] }
 0x5d3   :  { %v1392_v15 = vld [vmem:[#allocation2 + $0x4] sm:$0xff]  ;;  %v1373_v17 = vpack.c.bf16 %v1371_v12, %v1370_v14  ;;  %v1394_v21 = vld [vmem:[#allocation2 + $0x1c] sm:$0xff] }
 0x5d4   :  { %1408 = vrot.lane.b32.xlu0 %v1391_v57, %s2153_s28  ;;  %v1396_v20 = vpack.c.bf16 %v1393_v16, %v1392_v15  ;;  %v1395_v22 = vld [vmem:[#allocation2 + $0x24] sm:$0xff] }
 0x5d5   :  { %1402 = vrot.lane.b32.xlu1 %v1379_v58, %s2153_s28  ;;  %v1397_v23 = vpack.c.bf16 %v1395_v22, %v1394_v21 }
 0x642   :  { %v1407_v1 = vpop.permute.xlu0 %1406 }
 0x643   :  { %v1401_v2 = vpop.permute.xlu1 %1400  ;;  %v1420_v5 = vsel %vm55_vm0, %v1384_v0, %v1407_v1 }
 0x644   :  { %v1412_v4 = vsel %vm55_vm0, %v1372_v63, %v1401_v2  ;;  %1584 = vmatprep.mubr.bf16.mxu1 %v1420_v5 }
 0x645   :  { %1585 = vmatmul.mubr.bf16.vlgmr.msra.gmra.mrb[16].mxu1 %v1412_v4 }
 0x646   :  { %1989 = vmatpush3.bf16.msra.mxu1 %v2089_v45  ;;  %v1409_v9 = vpop.permute.xlu0 %1408 }
 0x647   :  { %v1424_v10 = vsel %vm55_vm0, %v1385_v8, %v1409_v9  ;;  %1990 = vmatprep.subr.bf16.mxu1 %v2090_v6  ;;  %v1403_v13 = vpop.permute.xlu1 %1402 }
 0x648   :  { %1592 = vmatprep.mubr.bf16.mxu1 %v1424_v10  ;;  %v1416_v19 = vsel %vm55_vm0, %v1373_v17, %v1403_v13 }
 0x64a   :  { %1991 = vmatpush3.bf16.msra.mxu1 %v2090_v6 }
 0x64b   :  { %1992 = vmatprep.subr.bf16.mxu1 %v2091_v11 }
 0x64d   :  { %1593 = vmatmul.mubr.bf16.gmra.mrb[20].mxu1 %v1416_v19 }
 0x64e   :  { %1993 = vmatpush3.bf16.msra.mxu1 %v2091_v11  ;;  %1996 = vmatprep.mubr.msk.bf16.mxu1 %vm55_vm0, %v1396_v20 }
 0x64f   :  { %1994 = vmatprep.subr.bf16.mxu1 %v2092_v18 }
 0x652   :  { %1995 = vmatpush3.bf16.msra.mxu1 %v2092_v18 }
 0x655   :  { %1997 = vmatmul.mubr.msk.bf16.vlgmr.msra.gmra.mrb[24].mxu1 %vm55_vm0, %v1397_v23 }
 0x718   :  { %v1920_v24 = vpop.f32.mrb[16].mxu1 }
 0x719   :  { %v1921_v25 = vpop.f32.mrb[17].mxu1 }
 0x71a   :  { %v1922_v26 = vadd.f32 %v1921_v25, %v1920_v24  ;;  %v1923_v27 = vpop.f32.mrb[18].mxu1 }
 0x71b   :  { %v1924_v28 = vpop.f32.mrb[19].mxu1 }
 0x71c   :  { %v1925_v29 = vadd.f32 %v1924_v28, %v1923_v27 }
 0x720   :  { %v1926_v30 = vpop.f32.mrb[20].mxu1 }
 0x721   :  { %v1927_v31 = vpop.f32.mrb[21].mxu1 }
 0x722   :  { %v1928_v32 = vadd.f32 %v1927_v31, %v1926_v30  ;;  %v1929_v33 = vpop.f32.mrb[22].mxu1 }
 0x723   :  { %v1930_v34 = vpop.f32.mrb[23].mxu1 }
 0x724   :  { %v1931_v35 = vadd.f32 %v1930_v34, %v1929_v33 }
 0x728   :  { %v1998_v37 = vpop.f32.mrb[24].mxu1 }
 0x729   :  { %v1644_v38 = vadd.f32 %v1998_v37, %v1928_v32  ;;  %v1635_v39 = vpop.f32.mrb[25].mxu1 }
 0x72a   :  { %v1636_v41 = vadd.f32 %v1922_v26, %v1635_v39  ;;  %v1999_v42 = vpop.f32.mrb[26].mxu1 }
 0x72b   :  { %v1658_v43 = vmul.f32 %v1793_v36, %v1644_v38  ;;  %v1647_v44 = vadd.f32 %v1999_v42, %v1931_v35  ;;  %v1638_v45 = vpop.f32.mrb[27].mxu1 }
 0x72c   :  { %v1656_v46 = vmul.f32 %v1793_v36, %v1636_v41  ;;  %v1639_v47 = vadd.f32 %v1925_v29, %v1638_v45 }
 0x72d   :  { %v1668_v48 = vadd.f32 %v1794_v40, %v1658_v43  ;;  %v1659_v49 = vmul.f32 %v1793_v36, %v1647_v44 }
 0x72e   :  { %v1666_v50 = vadd.f32 %v1794_v40, %v1656_v46  ;;  %v1657_v51 = vmul.f32 %v1793_v36, %v1639_v47 }
 0x72f   :  { %1672 = vst.msk [vmem:[#allocation3 + $0x10] sm:$0xff] %vm67_vm2, %v1668_v48  ;;  %v1669_v52 = vadd.f32 %v1794_v40, %v1659_v49 }
 0x730   :  { %1670 = vst.msk [vmem:[#allocation3] sm:$0xff] %vm67_vm2, %v1666_v50  ;;  %v1667_v53 = vadd.f32 %v1794_v40, %v1657_v51 }
 0x731   :  { %1673 = vst.msk [vmem:[#allocation3 + $0x18] sm:$0xff] %vm67_vm2, %v1669_v52 }
 0x732   :  { %1671 = vst.msk [vmem:[#allocation3 + $0x8] sm:$0xff] %vm67_vm2, %v1667_v53 }
 0x733   :  { %2136 = shalt.err (!%p2133_p4)
}
 0x734   :  { %s2137_s0 = scalar_lea.hbm %s2647_s16, 512 }
 0x735   :  { %p2138_p5 = scmp.ne.s32.totalorder %s2647_s16, %s2137_s0  ;;  %p2141_p6 = scmp.lt.u32.totalorder %s2137_s0, %s2647_s16 }
 0x737   :  { %p2143_p7 = pnand %p2141_p6, %p2138_p5 }
 0x739   :  { %2146 = shalt.err (!%p2143_p7)
}
 0x73a   :  { %s2155_s10 = smov 128   ;;  %s2156_s18 = smov 8  }
 0x73b   :  { %1685 = dma.vmem_to_hbm [thread:$0]  %s1680_s29, 512, %s2647_s16, [#allocation4], %s2155_s10, %s2155_s10, %s2156_s18  }
 0x73c   :  { %2147 = dma.done.wait [#allocation4], 512  }
 0x73d   :  { %2148 = vsyncadd [#allocation4], 4294966784 }
 0x73e   :  { %1689 = vsyncpa [#allocation4], 1 }

</bundles_post_ra>
